<compile_context>
chip_gen: v5e
topology: v5e:2x2
jax: 0.10.0
libtpu: 0.0.40
codegen_flags: <defaults>
</compile_context>

<pallas_src>
import jax
import jax.numpy as jnp
import numpy as np
from jax.experimental import pallas as pl
from jax.experimental.pallas import tpu as pltpu

# ----------------------------- problem sizes -------------------------------
NTOKEN = 100   # vocabulary size
B = 8          # batch
T = 8          # question sequence length
E = 128        # word embedding dim
N = 16         # num objects
DV = 128       # object feature dim
H = 128        # hidden dim
A = 128        # number of answer classes

# plane indices inside the packed weight stack [7, 128, 128] bf16
_WQ, _WVA, _WVN, _WC1, _WC2, _WQA, _WQN = range(7)
# bias/vector row indices (relative) inside the packed [32,128] f32 input;
# rows 0:B = q_mean, rows B:2B = v_mask (lane-padded), rows 2B: = biases
_BQ, _BVA, _BQA, _BQN, _BVN, _BC1, _BC2, _WATT, _BATT = range(9)
_BOFF = 2 * B  # bias rows start here inside the packed input


# ------------------------------- the kernel --------------------------------
def base_model_kernel(v_ref, packed_ref, w_stack_ref, logits_ref):
    f32 = jnp.float32
    bf16 = jnp.bfloat16

    def brow(i):                                  # one bias/vector row, [1, 128]
        return packed_ref[_BOFF + i:_BOFF + i + 1, :]

    v = v_ref[...]                                             # [B, N, Dv] f32
    # reshape keeps lane dim = 128 and merges contiguous sublanes -> layout no-op
    v2 = v.reshape(B * N, DV)

    # --- v_att object projection: the ONE independent full-width matmul.
    # Issued before the q-path so the scheduler overlaps it with the serial
    # M=8 q-path chain (MXU push/drain latency) — see perf review (v6e).
    v_proj = jnp.maximum(
        jnp.dot(v2.astype(bf16), w_stack_ref[_WVA], preferred_element_type=f32)
        + brow(_BVA), 0.0
    )                                                          # [B*N, H] (flat)

    # --- question embedding: Linear(E,H) + tanh (mean-pool done in wrapper) ---
    q_mean = packed_ref[0:B, :]                                # [B, E] f32
    mask = packed_ref[B:2 * B, 0:N]                            # [B, N] f32
    q_emb = jnp.tanh(
        jnp.dot(q_mean.astype(bf16), w_stack_ref[_WQ], preferred_element_type=f32)
        + brow(_BQ)
    )                                                          # [B, H] f32
    q_emb_bf = q_emb.astype(bf16)

    # --- q-path: two M=8 matmuls from the single weight stack (planes 5/6) ---
    q_proj = jnp.maximum(
        jnp.dot(q_emb_bf, w_stack_ref[_WQA], preferred_element_type=f32)
        + brow(_BQA), 0.0)                                     # v_att q-proj
    q_repr = jnp.maximum(
        jnp.dot(q_emb_bf, w_stack_ref[_WQN], preferred_element_type=f32)
        + brow(_BQN), 0.0)                                     # q_net

    # fold watt into the small q_proj instead of the [B*N, H] joint product
    qw = q_proj * brow(_WATT)                                  # [B, H]
    att_logits = (jnp.sum(v_proj.reshape(B, N, H) * qw[:, None, :], axis=-1)
                  + packed_ref[_BOFF + _BATT:_BOFF + _BATT + 1, 0:1])  # [B, N]

    # --- mask_softmax (exact torch semantics: GLOBAL max, sum over dim=1, eps) ---
    x2 = jnp.exp(att_logits - jnp.max(att_logits))
    x3 = x2 * mask
    x3_sum = jnp.sum(x3, axis=1, keepdims=True) + 1e-5
    att = x3 / x3_sum                                          # exact div (tiny)

    # --- attention-weighted pooling of object features ---
    v_emb = jnp.sum(att[:, :, None] * v, axis=1)               # [B, Dv] f32

    # --- v_net (FCNet = Linear + ReLU) ---
    v_repr = jnp.maximum(
        jnp.dot(v_emb.astype(bf16), w_stack_ref[_WVN], preferred_element_type=f32)
        + brow(_BVN), 0.0)                                     # [B, H]

    joint_repr = q_repr * v_repr                               # [B, H]

    # --- classifier: Linear + ReLU + Linear ---
    h1 = jnp.maximum(
        jnp.dot(joint_repr.astype(bf16), w_stack_ref[_WC1], preferred_element_type=f32)
        + brow(_BC1), 0.0)
    logits_ref[...] = (
        jnp.dot(h1.astype(bf16), w_stack_ref[_WC2], preferred_element_type=f32)
        + brow(_BC2)
    )                                                          # [B, A]


# ------------------------------ params --------------------------------------
def make_params(key):
    ks = jax.random.split(key, 16)
    s = 0.05
    p = {
        "emb_table": s * jax.random.normal(ks[0], (NTOKEN, E), jnp.float32),
        "wq":  s * jax.random.normal(ks[1], (E, H), jnp.float32),
        "bq":  s * jax.random.normal(ks[2], (1, H), jnp.float32),
        "wva": s * jax.random.normal(ks[3], (DV, H), jnp.float32),
        "bva": s * jax.random.normal(ks[4], (1, H), jnp.float32),
        "wqa": s * jax.random.normal(ks[5], (H, H), jnp.float32),
        "bqa": s * jax.random.normal(ks[6], (1, H), jnp.float32),
        "watt": s * jax.random.normal(ks[7], (1, H), jnp.float32),
        "batt": s * jax.random.normal(ks[8], (1, 1), jnp.float32),
        "wqn": s * jax.random.normal(ks[9], (H, H), jnp.float32),
        "bqn": s * jax.random.normal(ks[10], (1, H), jnp.float32),
        "wvn": s * jax.random.normal(ks[11], (DV, H), jnp.float32),
        "bvn": s * jax.random.normal(ks[12], (1, H), jnp.float32),
        "wc1": s * jax.random.normal(ks[13], (H, H), jnp.float32),
        "bc1": s * jax.random.normal(ks[14], (1, H), jnp.float32),
        "wc2": s * jax.random.normal(ks[15], (H, A), jnp.float32),
        "bc2": jnp.zeros((1, A), jnp.float32),
    }
    # --- pack once at param-creation, not per call ---
    p["w_stack"] = jnp.stack(
        [p["wq"], p["wva"], p["wvn"], p["wc1"], p["wc2"], p["wqa"], p["wqn"]]
    ).astype(jnp.bfloat16)                                     # [7, 128, 128] bf16
    b9 = jnp.concatenate(
        [p["bq"], p["bva"], p["bqa"], p["bqn"], p["bvn"], p["bc1"], p["bc2"],
         p["watt"], jnp.broadcast_to(p["batt"], (1, H))], axis=0
    ).astype(jnp.float32)                                      # [9, 128] f32
    # pad to 16 rows so the final packed per-call input is a clean [32, 128]
    p["b_pad"] = jnp.zeros((16, H), jnp.float32).at[:9, :].set(b9)
    return p


# ------------------------------ JAX wrapper ---------------------------------
_COST = pl.CostEstimate(
    flops=2 * B * (E * H + 2 * H * H + N * DV * H + DV * H + H * H + H * A)
          + 4 * B * N * DV,
    transcendentals=B * H + B * N,
    bytes_accessed=(B * N * DV + 32 * H + B * A) * 4 + 7 * H * H * 2,
)


def base_model_forward(v, q_tokens, labels, bias, v_mask, epoch, params):
    """Mirrors BaseModel.forward. labels/bias/epoch unused when labels is None."""
    del bias, epoch
    # glue: embedding gather + mean-pool over T (fuses in XLA; 8x smaller kernel input)
    w_emb = params["emb_table"][q_tokens.astype(jnp.int32)]          # [B, T, E]
    q_mean = jnp.mean(w_emb, axis=1)                                 # [B, E]
    vmask_pad = jnp.zeros((B, H), jnp.float32).at[:, :N].set(
        v_mask.astype(jnp.float32))                                  # [B, 128]
    # single packed per-call f32 operand: q_mean | padded v_mask | biases
    packed = jnp.concatenate([q_mean, vmask_pad, params["b_pad"]], axis=0)  # [32,128]

    vmem = pl.BlockSpec(memory_space=pltpu.MemorySpace.VMEM)
    logits = pl.pallas_call(
        base_model_kernel,
        out_shape=jax.ShapeDtypeStruct((B, A), jnp.float32),
        in_specs=[vmem] * 3,
        out_specs=vmem,
        cost_estimate=_COST,
    )(v, packed, params["w_stack"])

    # TODO(synk): debias_loss_fn is an injected, undefined module in the spec;
    # the labels-not-None loss path is not implemented (loss stays None).
    loss = None
    return logits, loss, w_emb


# pure-JAX reference (same math; weights bf16-rounded to match kernel storage)
def reference_forward(v, q_tokens, v_mask, p):
    bf = lambda w: w.astype(jnp.bfloat16).astype(jnp.float32)
    w_emb = p["emb_table"][q_tokens.astype(jnp.int32)]
    q_emb = jnp.tanh(jnp.mean(w_emb, axis=1) @ bf(p["wq"]) + p["bq"])
    v_proj = jnp.maximum(v.reshape(B * N, DV) @ bf(p["wva"]) + p["bva"], 0.0).reshape(B, N, H)
    q_proj = jnp.maximum(q_emb @ bf(p["wqa"]) + p["bqa"], 0.0)
    att_logits = jnp.sum(v_proj * q_proj[:, None, :] * p["watt"], axis=-1) + p["batt"]
    mask = v_mask.astype(jnp.float32)
    x2 = jnp.exp(att_logits - jnp.max(att_logits))
    x3 = x2 * mask
    att = x3 / (jnp.sum(x3, axis=1, keepdims=True) + 1e-5)
    v_emb = jnp.sum(att[:, :, None] * v, axis=1)
    q_repr = jnp.maximum(q_emb @ bf(p["wqn"]) + p["bqn"], 0.0)
    v_repr = jnp.maximum(v_emb @ bf(p["wvn"]) + p["bvn"], 0.0)
    joint = q_repr * v_repr
    h1 = jnp.maximum(joint @ bf(p["wc1"]) + p["bc1"], 0.0)
    return h1 @ bf(p["wc2"]) + p["bc2"]


if __name__ == "__main__":
    key = jax.random.PRNGKey(0)
    k_p, k_v, k_q, k_m = jax.random.split(key, 4)

    params = make_params(k_p)
    v = jax.random.normal(k_v, (B, N, DV), jnp.float32)                   # [batch, num_objs, obj_dim]
    q_tokens = jax.random.randint(k_q, (B, T), 0, NTOKEN)                 # [batch, seq_len]
    v_mask = (jax.random.uniform(k_m, (B, N)) > 0.3).astype(jnp.float32)  # [batch, num_objs]
    v_mask = v_mask.at[:, 0].set(1.0)  # make sure no row is fully masked

    fwd = jax.jit(base_model_forward)
    logits, loss, w_emb = fwd(v, q_tokens, None, None, v_mask, 0, params)
    logits = jax.block_until_ready(logits)

    ref = reference_forward(v, q_tokens, v_mask, params)
    np.testing.assert_allclose(np.asarray(logits), np.asarray(ref), rtol=2e-2, atol=2e-3)

    assert logits.shape == (B, A) and loss is None and w_emb.shape == (B, T, E)
    print("KERNEL_OK")
</pallas_src>

<mosaic_0001>
module attributes {stable_mosaic.version = 11 : i64} {
  func.func @base_model_kernel(%arg0: memref<8x16x128xf32, #tpu.memory_space<vmem>>, %arg1: memref<32x128xf32, #tpu.memory_space<vmem>>, %arg2: memref<7x128x128xbf16, #tpu.memory_space<vmem>>, %arg3: memref<8x128xf32, #tpu.memory_space<vmem>>) attributes {dimension_semantics = [], scalar_prefetch = 0 : i64, scratch_operands = 0 : i64, tpu.core_type = #tpu.core_type<tc>} {
    %c0 = arith.constant 0 : index
    %c0_0 = arith.constant 0 : index
    %c0_1 = arith.constant 0 : index
    %0 = vector.load %arg0[%c0, %c0_0, %c0_1] : memref<8x16x128xf32, #tpu.memory_space<vmem>>, vector<8x16x128xf32>
    %1 = vector.shape_cast %0 : vector<8x16x128xf32> to vector<128x128xf32>
    %2 = arith.truncf %1 : vector<128x128xf32> to vector<128x128xbf16>
    %c1 = arith.constant 1 : index
    %c0_2 = arith.constant 0 : index
    %c0_3 = arith.constant 0 : index
    %3 = vector.load %arg2[%c1, %c0_2, %c0_3] : memref<7x128x128xbf16, #tpu.memory_space<vmem>>, vector<1x128x128xbf16>
    %4 = vector.shape_cast %3 : vector<1x128x128xbf16> to vector<128x128xbf16>
    %cst = arith.constant dense<0.000000e+00> : vector<128x128xf32>
    %5 = tpu.matmul %2, %4, %cst {dimension_numbers = #tpu.dot_dimension_numbers<[1], [0], [0], [1], [0, 0, 1, 1], [], []>} : vector<128x128xbf16>, vector<128x128xbf16>, vector<128x128xf32> -> vector<128x128xf32>
    %c17 = arith.constant 17 : index
    %c0_4 = arith.constant 0 : index
    %6 = vector.load %arg1[%c17, %c0_4] : memref<32x128xf32, #tpu.memory_space<vmem>>, vector<1x128xf32>
    %7 = vector.broadcast %6 : vector<1x128xf32> to vector<128x128xf32>
    %8 = arith.addf %5, %7 : vector<128x128xf32>
    %cst_5 = arith.constant 0.000000e+00 : f32
    %9 = vector.broadcast %cst_5 : f32 to vector<128x128xf32>
    %10 = arith.maximumf %8, %9 : vector<128x128xf32>
    %c0_6 = arith.constant 0 : index
    %c0_7 = arith.constant 0 : index
    %11 = vector.load %arg1[%c0_6, %c0_7] : memref<32x128xf32, #tpu.memory_space<vmem>>, vector<8x128xf32>
    %c8 = arith.constant 8 : index
    %c0_8 = arith.constant 0 : index
    %12 = vector.load %arg1[%c8, %c0_8] : memref<32x128xf32, #tpu.memory_space<vmem>>, vector<8x16xf32>
    %13 = arith.truncf %11 : vector<8x128xf32> to vector<8x128xbf16>
    %c0_9 = arith.constant 0 : index
    %c0_10 = arith.constant 0 : index
    %c0_11 = arith.constant 0 : index
    %14 = vector.load %arg2[%c0_9, %c0_10, %c0_11] : memref<7x128x128xbf16, #tpu.memory_space<vmem>>, vector<1x128x128xbf16>
    %15 = vector.shape_cast %14 : vector<1x128x128xbf16> to vector<128x128xbf16>
    %cst_12 = arith.constant dense<0.000000e+00> : vector<8x128xf32>
    %16 = tpu.matmul %13, %15, %cst_12 {dimension_numbers = #tpu.dot_dimension_numbers<[1], [0], [0], [1], [0, 0, 1, 1], [], []>} : vector<8x128xbf16>, vector<128x128xbf16>, vector<8x128xf32> -> vector<8x128xf32>
    %c16 = arith.constant 16 : index
    %c0_13 = arith.constant 0 : index
    %17 = vector.load %arg1[%c16, %c0_13] : memref<32x128xf32, #tpu.memory_space<vmem>>, vector<1x128xf32>
    %18 = vector.broadcast %17 : vector<1x128xf32> to vector<8x128xf32>
    %19 = arith.addf %16, %18 : vector<8x128xf32>
    %20 = math.tanh %19 : vector<8x128xf32>
    %21 = arith.truncf %20 : vector<8x128xf32> to vector<8x128xbf16>
    %c5 = arith.constant 5 : index
    %c0_14 = arith.constant 0 : index
    %c0_15 = arith.constant 0 : index
    %22 = vector.load %arg2[%c5, %c0_14, %c0_15] : memref<7x128x128xbf16, #tpu.memory_space<vmem>>, vector<1x128x128xbf16>
    %23 = vector.shape_cast %22 : vector<1x128x128xbf16> to vector<128x128xbf16>
    %cst_16 = arith.constant dense<0.000000e+00> : vector<8x128xf32>
    %24 = tpu.matmul %21, %23, %cst_16 {dimension_numbers = #tpu.dot_dimension_numbers<[1], [0], [0], [1], [0, 0, 1, 1], [], []>} : vector<8x128xbf16>, vector<128x128xbf16>, vector<8x128xf32> -> vector<8x128xf32>
    %c18 = arith.constant 18 : index
    %c0_17 = arith.constant 0 : index
    %25 = vector.load %arg1[%c18, %c0_17] : memref<32x128xf32, #tpu.memory_space<vmem>>, vector<1x128xf32>
    %26 = vector.broadcast %25 : vector<1x128xf32> to vector<8x128xf32>
    %27 = arith.addf %24, %26 : vector<8x128xf32>
    %cst_18 = arith.constant 0.000000e+00 : f32
    %28 = vector.broadcast %cst_18 : f32 to vector<8x128xf32>
    %29 = arith.maximumf %27, %28 : vector<8x128xf32>
    %c6 = arith.constant 6 : index
    %c0_19 = arith.constant 0 : index
    %c0_20 = arith.constant 0 : index
    %30 = vector.load %arg2[%c6, %c0_19, %c0_20] : memref<7x128x128xbf16, #tpu.memory_space<vmem>>, vector<1x128x128xbf16>
    %31 = vector.shape_cast %30 : vector<1x128x128xbf16> to vector<128x128xbf16>
    %cst_21 = arith.constant dense<0.000000e+00> : vector<8x128xf32>
    %32 = tpu.matmul %21, %31, %cst_21 {dimension_numbers = #tpu.dot_dimension_numbers<[1], [0], [0], [1], [0, 0, 1, 1], [], []>} : vector<8x128xbf16>, vector<128x128xbf16>, vector<8x128xf32> -> vector<8x128xf32>
    %c19 = arith.constant 19 : index
    %c0_22 = arith.constant 0 : index
    %33 = vector.load %arg1[%c19, %c0_22] : memref<32x128xf32, #tpu.memory_space<vmem>>, vector<1x128xf32>
    %34 = vector.broadcast %33 : vector<1x128xf32> to vector<8x128xf32>
    %35 = arith.addf %32, %34 : vector<8x128xf32>
    %cst_23 = arith.constant 0.000000e+00 : f32
    %36 = vector.broadcast %cst_23 : f32 to vector<8x128xf32>
    %37 = arith.maximumf %35, %36 : vector<8x128xf32>
    %c23 = arith.constant 23 : index
    %c0_24 = arith.constant 0 : index
    %38 = vector.load %arg1[%c23, %c0_24] : memref<32x128xf32, #tpu.memory_space<vmem>>, vector<1x128xf32>
    %39 = vector.broadcast %38 : vector<1x128xf32> to vector<8x128xf32>
    %40 = arith.mulf %29, %39 : vector<8x128xf32>
    %41 = vector.shape_cast %10 : vector<128x128xf32> to vector<8x16x128xf32>
    %42 = vector.shape_cast %40 : vector<8x128xf32> to vector<8x1x128xf32>
    %43 = vector.broadcast %42 : vector<8x1x128xf32> to vector<8x16x128xf32>
    %44 = arith.mulf %41, %43 : vector<8x16x128xf32>
    %cst_25 = arith.constant dense<0.000000e+00> : vector<8x16xf32>
    %45 = vector.multi_reduction <add>, %44, %cst_25 [2] : vector<8x16x128xf32> to vector<8x16xf32>
    %c24 = arith.constant 24 : index
    %c0_26 = arith.constant 0 : index
    %46 = vector.load %arg1[%c24, %c0_26] : memref<32x128xf32, #tpu.memory_space<vmem>>, vector<1x1xf32>
    %47 = vector.broadcast %46 : vector<1x1xf32> to vector<8x16xf32>
    %48 = arith.addf %45, %47 : vector<8x16xf32>
    %49 = vector.shape_cast %48 : vector<8x16xf32> to vector<1x8x16xf32>
    %cst_27 = arith.constant dense<0xFF800000> : vector<1xf32>
    %50 = vector.multi_reduction <maximumf>, %49, %cst_27 [1, 2] : vector<1x8x16xf32> to vector<1xf32>
    %51 = vector.shape_cast %50 : vector<1xf32> to vector<1x1x1xf32>
    %52 = vector.extract %51[0, 0, 0] : f32 from vector<1x1x1xf32>
    %53 = vector.broadcast %52 : f32 to vector<8x16xf32>
    %54 = arith.subf %48, %53 : vector<8x16xf32>
    %55 = math.exp %54 : vector<8x16xf32>
    %56 = arith.mulf %55, %12 : vector<8x16xf32>
    %cst_28 = arith.constant dense<0.000000e+00> : vector<8xf32>
    %57 = vector.multi_reduction <add>, %56, %cst_28 [1] : vector<8x16xf32> to vector<8xf32>
    %58 = vector.shape_cast %57 : vector<8xf32> to vector<8x1xf32>
    %cst_29 = arith.constant 9.99999974E-6 : f32
    %59 = vector.broadcast %cst_29 : f32 to vector<8x1xf32>
    %60 = arith.addf %58, %59 : vector<8x1xf32>
    %61 = vector.broadcast %60 : vector<8x1xf32> to vector<8x16xf32>
    %62 = arith.divf %56, %61 : vector<8x16xf32>
    %63 = vector.shape_cast %62 : vector<8x16xf32> to vector<8x16x1xf32>
    %64 = vector.broadcast %63 : vector<8x16x1xf32> to vector<8x16x128xf32>
    %65 = arith.mulf %64, %0 : vector<8x16x128xf32>
    %cst_30 = arith.constant dense<0.000000e+00> : vector<8x128xf32>
    %66 = vector.multi_reduction <add>, %65, %cst_30 [1] : vector<8x16x128xf32> to vector<8x128xf32>
    %67 = arith.truncf %66 : vector<8x128xf32> to vector<8x128xbf16>
    %c2 = arith.constant 2 : index
    %c0_31 = arith.constant 0 : index
    %c0_32 = arith.constant 0 : index
    %68 = vector.load %arg2[%c2, %c0_31, %c0_32] : memref<7x128x128xbf16, #tpu.memory_space<vmem>>, vector<1x128x128xbf16>
    %69 = vector.shape_cast %68 : vector<1x128x128xbf16> to vector<128x128xbf16>
    %cst_33 = arith.constant dense<0.000000e+00> : vector<8x128xf32>
    %70 = tpu.matmul %67, %69, %cst_33 {dimension_numbers = #tpu.dot_dimension_numbers<[1], [0], [0], [1], [0, 0, 1, 1], [], []>} : vector<8x128xbf16>, vector<128x128xbf16>, vector<8x128xf32> -> vector<8x128xf32>
    %c20 = arith.constant 20 : index
    %c0_34 = arith.constant 0 : index
    %71 = vector.load %arg1[%c20, %c0_34] : memref<32x128xf32, #tpu.memory_space<vmem>>, vector<1x128xf32>
    %72 = vector.broadcast %71 : vector<1x128xf32> to vector<8x128xf32>
    %73 = arith.addf %70, %72 : vector<8x128xf32>
    %cst_35 = arith.constant 0.000000e+00 : f32
    %74 = vector.broadcast %cst_35 : f32 to vector<8x128xf32>
    %75 = arith.maximumf %73, %74 : vector<8x128xf32>
    %76 = arith.mulf %37, %75 : vector<8x128xf32>
    %77 = arith.truncf %76 : vector<8x128xf32> to vector<8x128xbf16>
    %c3 = arith.constant 3 : index
    %c0_36 = arith.constant 0 : index
    %c0_37 = arith.constant 0 : index
    %78 = vector.load %arg2[%c3, %c0_36, %c0_37] : memref<7x128x128xbf16, #tpu.memory_space<vmem>>, vector<1x128x128xbf16>
    %79 = vector.shape_cast %78 : vector<1x128x128xbf16> to vector<128x128xbf16>
    %cst_38 = arith.constant dense<0.000000e+00> : vector<8x128xf32>
    %80 = tpu.matmul %77, %79, %cst_38 {dimension_numbers = #tpu.dot_dimension_numbers<[1], [0], [0], [1], [0, 0, 1, 1], [], []>} : vector<8x128xbf16>, vector<128x128xbf16>, vector<8x128xf32> -> vector<8x128xf32>
    %c21 = arith.constant 21 : index
    %c0_39 = arith.constant 0 : index
    %81 = vector.load %arg1[%c21, %c0_39] : memref<32x128xf32, #tpu.memory_space<vmem>>, vector<1x128xf32>
    %82 = vector.broadcast %81 : vector<1x128xf32> to vector<8x128xf32>
    %83 = arith.addf %80, %82 : vector<8x128xf32>
    %cst_40 = arith.constant 0.000000e+00 : f32
    %84 = vector.broadcast %cst_40 : f32 to vector<8x128xf32>
    %85 = arith.maximumf %83, %84 : vector<8x128xf32>
    %86 = arith.truncf %85 : vector<8x128xf32> to vector<8x128xbf16>
    %c4 = arith.constant 4 : index
    %c0_41 = arith.constant 0 : index
    %c0_42 = arith.constant 0 : index
    %87 = vector.load %arg2[%c4, %c0_41, %c0_42] : memref<7x128x128xbf16, #tpu.memory_space<vmem>>, vector<1x128x128xbf16>
    %88 = vector.shape_cast %87 : vector<1x128x128xbf16> to vector<128x128xbf16>
    %cst_43 = arith.constant dense<0.000000e+00> : vector<8x128xf32>
    %89 = tpu.matmul %86, %88, %cst_43 {dimension_numbers = #tpu.dot_dimension_numbers<[1], [0], [0], [1], [0, 0, 1, 1], [], []>} : vector<8x128xbf16>, vector<128x128xbf16>, vector<8x128xf32> -> vector<8x128xf32>
    %c22 = arith.constant 22 : index
    %c0_44 = arith.constant 0 : index
    %90 = vector.load %arg1[%c22, %c0_44] : memref<32x128xf32, #tpu.memory_space<vmem>>, vector<1x128xf32>
    %91 = vector.broadcast %90 : vector<1x128xf32> to vector<8x128xf32>
    %92 = arith.addf %89, %91 : vector<8x128xf32>
    %c0_45 = arith.constant 0 : index
    %c0_46 = arith.constant 0 : index
    %93 = vector.load %arg3[%c0_45, %c0_46] : memref<8x128xf32, #tpu.memory_space<vmem>>, vector<8x128xf32>
    tpu.vector_store %arg3[%c0_45, %c0_46], %92 {strides = array<i32>} : memref<8x128xf32, #tpu.memory_space<vmem>>, vector<8x128xf32>,
    return
  }
}

</mosaic_0001>

<bundles_post_ra>
// kernel: base_model_forward.1
= control target key start
LH: loop header
LB: loop body
LE: loop exit
PB: predicated region body
PF: predicated region fallthrough
CT: control target
= control target key end

     0   :  { %s2525_s0 = inlined_call_operand.vmem [shape: f32[8,16,128], index: 0, kind: input, shape index: {}]   ;;  %s2526_s1 = inlined_call_operand.vmem [shape: f32[32,128], index: 1, kind: input, shape index: {}]   ;;  %s2527_s2 = inlined_call_operand.vmem [shape: bf16[7,128,128], index: 2, kind: input, shape index: {}]   ;;  %s2528_s3 = inlined_call_operand.hbm [shape: f32[8,128], index: 3, kind: output, shape index: {}]  }
   0x1   :  { %v1752_v0 = vld [vmem:[%s2527_s2 + $0x78] sm:$0xff]  ;;  %v1751_v1 = vld [vmem:[%s2527_s2 + $0x70] sm:$0xff]  ;;  %v1750_v2 = vld [vmem:[%s2527_s2 + $0x68] sm:$0xff] }
   0x2   :  { %1801 = vmatpush.bf16.msra.mxu1 %v1752_v0  ;;  %106 = vmatpush.bf16.msra.mxu0 %v1752_v0 }
   0x3   :  { %1802 = vmatpush.bf16.msra.mxu2 %v1752_v0 }
   0x6   :  { %1803 = vmatpush.bf16.msra.mxu1 %v1751_v1  ;;  %107 = vmatpush.bf16.msra.mxu0 %v1751_v1 }
   0x7   :  { %1804 = vmatpush.bf16.msra.mxu2 %v1751_v1 }
   0x8   :  { %8 = vsyncpa [#allocation3], 0  ;;  %v1749_v3 = vld [vmem:[%s2527_s2 + $0x60] sm:$0xff]  ;;  %v1748_v4 = vld [vmem:[%s2527_s2 + $0x58] sm:$0xff]  ;;  %vm790_vm0 = vcmask 130112   ;;  %vm813_vm1 = vcmask 1041409  }
   0x9   :  { %v1747_v5 = vld [vmem:[%s2527_s2 + $0x50] sm:$0xff]  ;;  %v1746_v6 = vld [vmem:[%s2527_s2 + $0x48] sm:$0xff]  ;;  %v1745_v7 = vld [vmem:[%s2527_s2 + $0x40] sm:$0xff]  ;;  %vm815_vm2 = vcmask 1042434   ;;  %vm817_vm3 = vcmask 1043459   ;;  %vm819_vm4 = vcmask 1044484  }
   0xa   :  { %1805 = vmatpush.bf16.msra.mxu1 %v1750_v2  ;;  %108 = vmatpush.bf16.msra.mxu0 %v1750_v2  ;;  %v25_v8 = vld [vmem:[%s2525_s0 + $0x50] sm:$0xff]  ;;  %v26_v9 = vld [vmem:[%s2525_s0 + $0x58] sm:$0xff]  ;;  %v15_v13 = vld [vmem:[%s2525_s0] sm:$0xff]  ;;  %vm821_vm5 = vcmask 1045509   ;;  %vm823_vm6 = vcmask 1046534   ;;  %vm825_vm7 = vcmask 1047559  }
   0xb   :  { %1806 = vmatpush.bf16.msra.mxu2 %v1750_v2  ;;  %v1760_v10 = vld [vmem:[%s2527_s2 + $0x38] sm:$0xff]  ;;  %v36_v11 = vpack.c.bf16 %v26_v9, %v25_v8  ;;  %v1759_v12 = vld [vmem:[%s2527_s2 + $0x30] sm:$0xff]  ;;  %v16_v14 = vld [vmem:[%s2525_s0 + $0x8] sm:$0xff]  ;;  %vm828_vm8 = vcmask 130048   ;;  %s1934_s21 = smov [#allocation2]  }
   0xc   :  { %v31_v15 = vpack.c.bf16 %v16_v14, %v15_v13  ;;  %v1758_v16 = vld [vmem:[%s2527_s2 + $0x28] sm:$0xff]  ;;  %v1757_v17 = vld [vmem:[%s2527_s2 + $0x20] sm:$0xff]  ;;  %v1756_v20 = vld [vmem:[%s2527_s2 + $0x18] sm:$0xff]  ;;  %s1414_s22 = sshll.u32 %s1934_s21, 4  ;;  %s1415_s22 = int_to_ptr.vmem [resolvable:$true] %s1414_s22 }
   0xd   :  { %v27_v18 = vld [vmem:[%s2525_s0 + $0x60] sm:$0xff]  ;;  %v28_v19 = vld [vmem:[%s2525_s0 + $0x68] sm:$0xff]  ;;  %v17_v22 = vld [vmem:[%s2525_s0 + $0x10] sm:$0xff] }
   0xe   :  { %1807 = vmatpush.bf16.msra.mxu1 %v1749_v3  ;;  %109 = vmatpush.bf16.msra.mxu0 %v1749_v3  ;;  %v37_v21 = vpack.c.bf16 %v28_v19, %v27_v18  ;;  %v18_v23 = vld [vmem:[%s2525_s0 + $0x18] sm:$0xff]  ;;  %v1755_v24 = vld [vmem:[%s2527_s2 + $0x10] sm:$0xff]  ;;  %v1754_v26 = vld [vmem:[%s2527_s2 + $0x8] sm:$0xff] }
   0xf   :  { %1808 = vmatpush.bf16.msra.mxu2 %v1749_v3  ;;  %v32_v25 = vpack.c.bf16 %v18_v23, %v17_v22  ;;  %v1753_v27 = vld [vmem:[%s2527_s2] sm:$0xff]  ;;  %v1768_v30 = vld [vmem:[%s2527_s2 + $0x178] sm:$0xff]  ;;  %v20_v33 = vld [vmem:[%s2525_s0 + $0x28] sm:$0xff] }
  0x10   :  { %v171_v28 = vld [vmem:[%s2526_s1] sm:$0xff]  ;;  %v1776_v31 = vld [vmem:[%s2527_s2 + $0x1b8] sm:$0xff]  ;;  %v1767_v35 = vld [vmem:[%s2527_s2 + $0x170] sm:$0xff] }
  0x11   :  { %v173_v29 = vpack.c.bf16 %v171_v28, %v171_v28  ;;  %v19_v32 = vld [vmem:[%s2525_s0 + $0x20] sm:$0xff]  ;;  %403 = vmatpush.bf16.msra.mxu3 %v1776_v31  ;;  %v1775_v36 = vld [vmem:[%s2527_s2 + $0x1b0] sm:$0xff]  ;;  %v30_v38 = vld [vmem:[%s2525_s0 + $0x78] sm:$0xff] }
  0x12   :  { %1809 = vmatpush.bf16.msra.mxu1 %v1748_v4  ;;  %110 = vmatpush.bf16.msra.mxu0 %v1748_v4  ;;  %v33_v34 = vpack.c.bf16 %v20_v33, %v19_v32  ;;  %v29_v37 = vld [vmem:[%s2525_s0 + $0x70] sm:$0xff]  ;;  %v1766_v40 = vld [vmem:[%s2527_s2 + $0x168] sm:$0xff]  ;;  %v1765_v42 = vld [vmem:[%s2527_s2 + $0x160] sm:$0xff] }
  0x13   :  { %1810 = vmatpush.bf16.msra.mxu2 %v1748_v4  ;;  %v38_v39 = vpack.c.bf16 %v30_v38, %v29_v37  ;;  %v1774_v41 = vld [vmem:[%s2527_s2 + $0x1a8] sm:$0xff]  ;;  %v1773_v43 = vld [vmem:[%s2527_s2 + $0x1a0] sm:$0xff]  ;;  %v1764_v44 = vld [vmem:[%s2527_s2 + $0x158] sm:$0xff] }
  0x14   :  { %v1772_v45 = vld [vmem:[%s2527_s2 + $0x198] sm:$0xff]  ;;  %v21_v46 = vld [vmem:[%s2525_s0 + $0x30] sm:$0xff]  ;;  %v1762_v52 = vld [vmem:[%s2527_s2 + $0x148] sm:$0xff] }
  0x15   :  { %404 = vmatpush.bf16.msra.mxu3 %v1775_v36  ;;  %v22_v47 = vld [vmem:[%s2525_s0 + $0x38] sm:$0xff]  ;;  %v1763_v49 = vld [vmem:[%s2527_s2 + $0x150] sm:$0xff]  ;;  %v1770_v53 = vld [vmem:[%s2527_s2 + $0x188] sm:$0xff] }
  0x16   :  { %1811 = vmatpush.bf16.msra.mxu1 %v1747_v5  ;;  %111 = vmatpush.bf16.msra.mxu0 %v1747_v5  ;;  %v34_v48 = vpack.c.bf16 %v22_v47, %v21_v46  ;;  %v1771_v50 = vld [vmem:[%s2527_s2 + $0x190] sm:$0xff]  ;;  %v1761_v54 = vld [vmem:[%s2527_s2 + $0x140] sm:$0xff]  ;;  %v24_v58 = vld [vmem:[%s2525_s0 + $0x48] sm:$0xff] }
  0x17   :  { %1812 = vmatpush.bf16.msra.mxu2 %v1747_v5  ;;  %v1769_v55 = vld [vmem:[%s2527_s2 + $0x180] sm:$0xff]  ;;  %v1834_v62 = vld [vmem:[%s2526_s1 + $0x10] ss:$0 sm:$0xff]  ;;  %v1835_v13 = vld [vmem:[%s2526_s1 + $0x12] ss:$0 sm:$0xff] }
  0x18   :  { %v23_v57 = vld [vmem:[%s2525_s0 + $0x40] sm:$0xff]  ;;  %v1836_v18 = vld [vmem:[%s2526_s1 + $0x17] ss:$0 sm:$0xff] }
  0x19   :  { %405 = vmatpush.bf16.msra.mxu3 %v1774_v41  ;;  %v35_v59 = vpack.c.bf16 %v24_v58, %v23_v57 }
  0x1a   :  { %1813 = vmatpush.bf16.msra.mxu1 %v1746_v6  ;;  %112 = vmatpush.bf16.msra.mxu0 %v1746_v6 }
  0x1b   :  { %1814 = vmatpush.bf16.msra.mxu2 %v1746_v6 }
  0x1d   :  { %406 = vmatpush.bf16.msra.mxu3 %v1773_v43 }
  0x1e   :  { %1815 = vmatpush.bf16.msra.mxu1 %v1745_v7  ;;  %113 = vmatpush.bf16.msra.mxu0 %v1745_v7 }
  0x1f   :  { %1816 = vmatpush.bf16.msra.mxu2 %v1745_v7 }
  0x21   :  { %139 = vmatmul.bf16.vlgmr.msra.gmra.mxu1 %v36_v11  ;;  %114 = vmatmul.bf16.vlgmr.msra.gmra.mxu0 %v31_v15 }
  0x22   :  { %240 = vmatpush.bf16.msrb.mxu1 %v1760_v10  ;;  %149 = vmatmul.bf16.vlgmr.msra.gmra.mxu2 %v38_v39 }
  0x23   :  { %322 = vmatpush.bf16.msrb.mxu2 %v1768_v30  ;;  %407 = vmatpush.bf16.msra.mxu3 %v1772_v45 }
  0x26   :  { %241 = vmatpush.bf16.msrb.mxu1 %v1759_v12 }
  0x27   :  { %323 = vmatpush.bf16.msrb.mxu2 %v1767_v35  ;;  %408 = vmatpush.bf16.msra.mxu3 %v1771_v50 }
  0x2a   :  { %242 = vmatpush.bf16.msrb.mxu1 %v1758_v16  ;;  %v2125_v16 = vld [vmem:[%s2526_s1 + $0x11] ss:$0 sm:$0xff] }
  0x2b   :  { %324 = vmatpush.bf16.msrb.mxu2 %v1766_v40  ;;  %409 = vmatpush.bf16.msra.mxu3 %v1770_v53  ;;  %v492_v53 = vld [vmem:[%s2526_s1 + $0x18] sm:$0x1] }
  0x2c   :  { %1817 = vpush %v492_v53 }
  0x2e   :  { %243 = vmatpush.bf16.msrb.mxu1 %v1757_v17 }
  0x2f   :  { %325 = vmatpush.bf16.msrb.mxu2 %v1765_v42  ;;  %410 = vmatpush.bf16.msra.mxu3 %v1769_v55 }
  0x31   :  { %144 = vmatmul.bf16.gmra.mxu1 %v37_v21  ;;  %119 = vmatmul.bf16.gmra.mxu0 %v32_v25 }
  0x32   :  { %244 = vmatpush.bf16.msrb.mxu1 %v1756_v20 }
  0x33   :  { %326 = vmatpush.bf16.msrb.mxu2 %v1764_v44 }
  0x36   :  { %245 = vmatpush.bf16.msrb.mxu1 %v1755_v24 }
  0x37   :  { %327 = vmatpush.bf16.msrb.mxu2 %v1763_v49 }
  0x3a   :  { %246 = vmatpush.bf16.msrb.mxu1 %v1754_v26 }
  0x3b   :  { %328 = vmatpush.bf16.msrb.mxu2 %v1762_v52 }
  0x3e   :  { %247 = vmatpush.bf16.msrb.mxu1 %v1753_v27 }
  0x3f   :  { %329 = vmatpush.bf16.msrb.mxu2 %v1761_v54  ;;  %v586_v54 = vlaneseq }
  0x41   :  { %248 = vmatmul.bf16.vlgmr.msrb.gmra.mxu1 %v173_v29  ;;  %124 = vmatmul.bf16.gmra.mxu0 %v33_v34  ;;  %v2150_v58 = vshrl.u32 %v586_v54, 7 }
  0x43   :  { %1823 = vset.pattern.permute.xlu1 %v2150_v58 }
  0x51   :  { %129 = vmatmul.bf16.gmra.mxu0 %v34_v48 }
  0x5d   :  { %s1818_s14 = spop %1817 }
  0x61   :  { %134 = vmatmul.bf16.gmra.mxu0 %v35_v59 }
  0x9e   :  { %v2084_v51 = vpop.f32.mrf.mxu1  ;;  %v115_v4 = vpop.f32.mrf.mxu0 }
  0x9f   :  { %v116_v20 = vadd.f32 %v2125_v16, %v115_v4 }
  0xa1   :  { %v155_v25 = vmax.f32 %v116_v20, 0.0 }
  0xa5   :  { %v2113_v10 = vpop.f32.mrf.mxu2 }
  0xa6   :  { %v2098_v56 = vpop.f32.mrf.mxu1  ;;  %v117_v5 = vpop.f32.mrf.mxu0 }
  0xa7   :  { %v118_v36 = vadd.f32 %v2125_v16, %v117_v5 }
  0xa9   :  { %v156_v42 = vmax.f32 %v118_v36, 0.0 }
  0xad   :  { %v2115_v12 = vpop.f32.mrf.mxu2 }
  0xae   :  { %v2106_v60 = vpop.f32.mrf.mxu1  ;;  %v120_v6 = vpop.f32.mrf.mxu0 }
  0xaf   :  { %v121_v22 = vadd.f32 %v2125_v16, %v120_v6  ;;  %v146_v20 = vadd.f32 %v2125_v16, %v2106_v60  ;;  %v153_v60 = vadd.f32 %v2125_v16, %v2115_v12 }
  0xb1   :  { %v157_v29 = vmax.f32 %v121_v22, 0.0 }
  0xb6   :  { %v2108_v61 = vpop.f32.mrf.mxu1  ;;  %v122_v7 = vpop.f32.mrf.mxu0 }
  0xb7   :  { %v123_v40 = vadd.f32 %v2125_v16, %v122_v7 }
  0xb9   :  { %v158_v43 = vmax.f32 %v123_v40, 0.0 }
  0xbe   :  { %v249_v63 = vpop.f32.mrf.mxu1  ;;  %v125_v8 = vpop.f32.mrf.mxu0 }
  0xbf   :  { %v250_v0 = vadd.f32 %v1834_v62, %v249_v63  ;;  %v126_v23 = vadd.f32 %v2125_v16, %v125_v8  ;;  %v141_v8 = vadd.f32 %v2125_v16, %v2084_v51 }
  0xc1   :  { %1841 = vtanh.f32 %v250_v0  ;;  %v159_v32 = vmax.f32 %v126_v23, 0.0  ;;  %v151_v23 = vadd.f32 %v2125_v16, %v2113_v10  ;;  %v172_v10 = vld [vmem:[%s2526_s1 + $0x8] sm:$0xff] }
  0xc2   :  { %v611_v36 = vperm.slane %v172_v10, 2  ;;  %v624_v12 = vperm.slane %v172_v10, 3 }
  0xc6   :  { %v251_v1 = vpop.f32.mrf.mxu1  ;;  %v127_v9 = vpop.f32.mrf.mxu0 }
  0xc7   :  { %v1842_v2 = vpop.eup %1841  ;;  %v128_v41 = vadd.f32 %v2125_v16, %v127_v9  ;;  %v2154_v1 = vadd.s32 8, %v2150_v58  ;;  %v143_v9 = vadd.f32 %v2125_v16, %v2098_v56  ;;  %v148_v56 = vadd.f32 %v2125_v16, %v2108_v61 }
  0xc8   :  { %v254_v3 = vpack.c.bf16 %v1842_v2, %v1842_v2  ;;  %v170_v61 = vmax.f32 %v153_v60, 0.0 }
  0xc9   :  { %v160_v44 = vmax.f32 %v128_v41, 0.0  ;;  %1824 = vset.pattern.permute.xlu2 %v2154_v1  ;;  %1825 = vset.pattern.permute.xlu0 %v2154_v1 }
  0xca   :  { %330 = vmatmul.bf16.vlgmr.msrb.gmra.mxu2 %v254_v3  ;;  %411 = vmatmul.bf16.vlgmr.msra.gmra.mxu3 %v254_v3 }
  0xce   :  { %v130_v11 = vpop.f32.mrf.mxu0 }
  0xcf   :  { %v131_v47 = vadd.f32 %v2125_v16, %v130_v11 }
  0xd1   :  { %v161_v62 = vmax.f32 %v131_v47, 0.0 }
  0xd6   :  { %v132_v19 = vpop.f32.mrf.mxu0 }
  0xd7   :  { %v133_v55 = vadd.f32 %v2125_v16, %v132_v19 }
  0xd9   :  { %v162_v2 = vmax.f32 %v133_v55, 0.0 }
  0xde   :  { %v135_v39 = vpop.f32.mrf.mxu0 }
  0xdf   :  { %v136_v48 = vadd.f32 %v2125_v16, %v135_v39 }
  0xe1   :  { %v163_v63 = vmax.f32 %v136_v48, 0.0 }
  0xe6   :  { %v137_v59 = vpop.f32.mrf.mxu0 }
  0xe7   :  { %v138_v3 = vadd.f32 %v2125_v16, %v137_v59  ;;  %v676_v16 = vperm.slane %v172_v10, 7 }
  0xe9   :  { %v164_v11 = vmax.f32 %v138_v3, 0.0 }
 0x14d   :  { %v331_v14 = vpop.f32.mrf.mxu2  ;;  %v2120_v15 = vpop.f32.mrf.mxu3 }
 0x14e   :  { %v332_v17 = vadd.f32 %v1835_v13, %v331_v14  ;;  %v165_v14 = vmax.f32 %v141_v8, 0.0 }
 0x150   :  { %v335_v21 = vmax.f32 %v332_v17, 0.0  ;;  %v166_v17 = vmax.f32 %v143_v9, 0.0 }
 0x152   :  { %v2133_v24 = vmul.f32 %v1836_v18, %v335_v21 }
 0x154   :  { %v428_v26 = vperm.slane %v2133_v24, 0  ;;  %v422_v27 = vrot.slane %v2133_v24, 2  ;;  %v421_v28 = vrot.slane %v2133_v24, 1  ;;  %v423_v46 = vrot.slane %v2133_v24, 3 }
 0x155   :  { %v333_v30 = vpop.f32.mrf.mxu2  ;;  %v414_v31 = vpop.f32.mrf.mxu3  ;;  %v424_v52 = vrot.slane %v2133_v24, 4  ;;  %v425_v7 = vrot.slane %v2133_v24, 5  ;;  %v426_v19 = vrot.slane %v2133_v24, 6  ;;  %v427_v51 = vrot.slane %v2133_v24, 7 }
 0x156   :  { %v444_v33 = vmul.f32 %v428_v26, %v155_v25  ;;  %v430_v34 = vperm.slane %v422_v27, 0  ;;  %v429_v35 = vperm.slane %v421_v28, 0  ;;  %v445_v45 = vmul.f32 %v428_v26, %v156_v42 }
 0x157   :  { %v431_v57 = vperm.slane %v423_v46, 0  ;;  %v432_v0 = vperm.slane %v424_v52, 0  ;;  %v433_v13 = vperm.slane %v425_v7, 0  ;;  %v434_v25 = vperm.slane %v426_v19, 0 }
 0x158   :  { %460 = vadd.xlane.f32.xlu0 %v444_v33  ;;  %v448_v37 = vmul.f32 %v430_v34, %v159_v32  ;;  %v446_v38 = vmul.f32 %v429_v35, %v157_v29  ;;  %v449_v49 = vmul.f32 %v430_v34, %v160_v44  ;;  %v447_v50 = vmul.f32 %v429_v35, %v158_v43 }
 0x159   :  { %v450_v4 = vmul.f32 %v431_v57, %v161_v62  ;;  %v452_v5 = vmul.f32 %v432_v0, %v163_v63  ;;  %v451_v6 = vmul.f32 %v431_v57, %v162_v2  ;;  %v453_v18 = vmul.f32 %v432_v0, %v164_v11 }
 0x15a   :  { %468 = vadd.xlane.f32.xlu2 %v448_v37  ;;  %464 = vadd.xlane.f32.xlu1 %v446_v38  ;;  %v455_v21 = vmul.f32 %v433_v13, %v166_v17  ;;  %v454_v22 = vmul.f32 %v433_v13, %v165_v14  ;;  %v167_v26 = vmax.f32 %v146_v20, 0.0  ;;  %v435_v27 = vperm.slane %v427_v51, 0 }
 0x15b   :  { %v168_v28 = vmax.f32 %v148_v56, 0.0  ;;  %v169_v29 = vmax.f32 %v151_v23, 0.0  ;;  %v585_v33 = vperm.slane %v172_v10, 0  ;;  %v637_v34 = vperm.slane %v172_v10, 4 }
 0x15c   :  { %v456_v30 = vmul.f32 %v434_v25, %v167_v26  ;;  %v459_v32 = vmul.f32 %v435_v27, %v170_v61  ;;  %v598_v35 = vperm.slane %v172_v10, 1  ;;  %v650_v37 = vperm.slane %v172_v10, 5 }
 0x15d   :  { %v458_v31 = vmul.f32 %v435_v27, %v169_v29  ;;  %v457_v24 = vmul.f32 %v434_v25, %v168_v28  ;;  %v663_v38 = vperm.slane %v172_v10, 6  ;;  %v495_v52 = vstv %s1818_s14 }
 0x160   :  { %462 = vadd.xlane.f32.xlu0 %v445_v45 }
 0x162   :  { %470 = vadd.xlane.f32.xlu2 %v449_v49  ;;  %466 = vadd.xlane.f32.xlu1 %v447_v50 }
 0x168   :  { %472 = vadd.xlane.f32.xlu0 %v450_v4 }
 0x16a   :  { %476 = vadd.xlane.f32.xlu2 %v452_v5  ;;  %474 = vadd.xlane.f32.xlu1 %v451_v6 }
 0x170   :  { %478 = vadd.xlane.f32.xlu0 %v453_v18 }
 0x172   :  { %482 = vadd.xlane.f32.xlu2 %v455_v21  ;;  %480 = vadd.xlane.f32.xlu1 %v454_v22 }
 0x178   :  { %484 = vadd.xlane.f32.xlu0 %v456_v30 }
 0x17a   :  { %488 = vadd.xlane.f32.xlu2 %v458_v31  ;;  %486 = vadd.xlane.f32.xlu1 %v457_v24 }
 0x180   :  { %490 = vadd.xlane.f32.xlu0 %v459_v32 }
 0x192   :  { %596 = vperm.xlu2 %1824, %v585_v33  }
 0x193   :  { %590 = vperm.xlu1 %1823, %v585_v33   ;;  %v1933_v33 = vmov 0  }
 0x194   :  { %648 = vperm.xlu0 %1825, %v637_v34  }
 0x19a   :  { %609 = vperm.xlu2 %1824, %v598_v35  }
 0x19b   :  { %616 = vperm.xlu1 %1823, %v611_v36  }
 0x19c   :  { %1826 = vset.pattern.permute.xlu0 %v2150_v58 }
 0x1a2   :  { %622 = vperm.xlu2 %1824, %v611_v36  }
 0x1a3   :  { %629 = vperm.xlu1 %1823, %v624_v12  }
 0x1a4   :  { %603 = vperm.xlu0 %1826, %v598_v35  }
 0x1aa   :  { %635 = vperm.xlu2 %1824, %v624_v12  }
 0x1ab   :  { %642 = vperm.xlu1 %1823, %v637_v34  }
 0x1ac   :  { %681 = vperm.xlu0 %1826, %v676_v16  }
 0x1b2   :  { %1827 = vset.pattern.permute.xlu2 %v2150_v58 }
 0x1b3   :  { %1828 = vset.pattern.permute.xlu1 %v2154_v1 }
 0x1b4   :  { %1832 = vset.pattern.permute.xlu0 %v1933_v33 }
 0x1ba   :  { %655 = vperm.xlu2 %1827, %v650_v37  }
 0x1bb   :  { %661 = vperm.xlu1 %1828, %v650_v37  }
 0x1c2   :  { %668 = vperm.xlu2 %1827, %v663_v38  }
 0x1c3   :  { %674 = vperm.xlu1 %1828, %v663_v38  }
 0x1ca   :  { %1829 = vset.pattern.permute.xlu2 %v2154_v1 }
 0x1cb   :  { %v461_v39 = vpop.xlane.xlu0 %460  ;;  %1830 = vset.pattern.permute.xlu1 %v1933_v33 }
 0x1cc   :  { %v497_v1 = vadd.f32 %v495_v52, %v461_v39 }
 0x1cd   :  { %v469_v40 = vpop.xlane.xlu2 %468  ;;  %v465_v41 = vpop.xlane.xlu1 %464 }
 0x1ce   :  { %v2183_v57 = vadd.f32 %v495_v52, %v469_v40  ;;  %v499_v2 = vadd.f32 %v495_v52, %v465_v41 }
 0x1d0   :  { %v513_v11 = vmax.f32 %v497_v1, %v2183_v57 }
 0x1d2   :  { %687 = vperm.xlu2 %1829, %v676_v16  }
 0x1d3   :  { %v463_v42 = vpop.xlane.xlu0 %462 }
 0x1d4   :  { %v498_v62 = vadd.f32 %v495_v52, %v463_v42 }
 0x1d5   :  { %v471_v43 = vpop.xlane.xlu2 %470  ;;  %v467_v44 = vpop.xlane.xlu1 %466 }
 0x1d6   :  { %v2181_v55 = vadd.f32 %v495_v52, %v471_v43  ;;  %v500_v3 = vadd.f32 %v495_v52, %v467_v44 }
 0x1d8   :  { %v514_v6 = vmax.f32 %v498_v62, %v2181_v55 }
 0x1da   :  { %1831 = vset.pattern.permute.xlu2 %v1933_v33 }
 0x1db   :  { %v473_v45 = vpop.xlane.xlu0 %472 }
 0x1dc   :  { %v2185_v58 = vadd.f32 %v495_v52, %v473_v45 }
 0x1dd   :  { %v477_v46 = vpop.xlane.xlu2 %476  ;;  %v475_v47 = vpop.xlane.xlu1 %474 }
 0x1de   :  { %v2187_v63 = vadd.f32 %v495_v52, %v475_v47  ;;  %v505_v4 = vadd.f32 %v495_v52, %v477_v46  ;;  %v515_v13 = vmax.f32 %v499_v2, %v2185_v58 }
 0x1e0   :  { %v516_v14 = vmax.f32 %v500_v3, %v2187_v63  ;;  %v517_v20 = vmax.f32 %v513_v11, %v505_v4 }
 0x1e3   :  { %v479_v48 = vpop.xlane.xlu0 %478 }
 0x1e4   :  { %v2189_v0 = vadd.f32 %v495_v52, %v479_v48 }
 0x1e5   :  { %v483_v49 = vpop.xlane.xlu2 %482  ;;  %v481_v50 = vpop.xlane.xlu1 %480 }
 0x1e6   :  { %v2192_v7 = vadd.f32 %v495_v52, %v483_v49  ;;  %v2194_v8 = vadd.f32 %v495_v52, %v481_v50  ;;  %v518_v17 = vmax.f32 %v514_v6, %v2189_v0 }
 0x1e8   :  { %v520_v22 = vmax.f32 %v516_v14, %v2192_v7  ;;  %v519_v51 = vmax.f32 %v515_v13, %v2194_v8 }
 0x1eb   :  { %v485_v53 = vpop.xlane.xlu0 %484 }
 0x1ec   :  { %v2202_v18 = vadd.f32 %v495_v52, %v485_v53 }
 0x1ed   :  { %v487_v59 = vpop.xlane.xlu1 %486  ;;  %v489_v5 = vpop.xlane.xlu2 %488 }
 0x1ee   :  { %v2196_v9 = vadd.f32 %v495_v52, %v487_v59  ;;  %v2204_v19 = vadd.f32 %v495_v52, %v489_v5  ;;  %v521_v25 = vmax.f32 %v517_v20, %v2202_v18 }
 0x1f0   :  { %v522_v56 = vmax.f32 %v518_v17, %v2196_v9  ;;  %v523_v26 = vmax.f32 %v519_v51, %v2204_v19 }
 0x1f2   :  { %v525_v28 = vmax.f32 %v521_v25, %v522_v56 }
 0x1f3   :  { %v491_v21 = vpop.xlane.xlu0 %490 }
 0x1f4   :  { %v2209_v23 = vadd.f32 %v495_v52, %v491_v21 }
 0x1f5   :  { %v597_v35 = vpop.permute.xlu2 %596 }
 0x1f6   :  { %v524_v27 = vmax.f32 %v520_v22, %v2209_v23 }
 0x1f8   :  { %v526_v29 = vmax.f32 %v523_v26, %v524_v27 }
 0x1fa   :  { %v527_v30 = vmax.f32 %v525_v28, %v526_v29 }
 0x1fc   :  { %v528_v60 = vrot.slane %v527_v30, 4 }
 0x1fd   :  { %v610_v39 = vpop.permute.xlu2 %609 }
 0x1fe   :  { %v529_v31 = vmax.f32 %v527_v30, %v528_v60 }
 0x200   :  { %v530_v24 = vrot.slane %v529_v31, 2 }
 0x202   :  { %v531_v61 = vmax.f32 %v529_v31, %v530_v24 }
 0x204   :  { %v532_v32 = vrot.slane %v531_v61, 1 }
 0x205   :  { %v591_v34 = vpop.permute.xlu1 %590  ;;  %v623_v50 = vpop.permute.xlu2 %622 }
 0x206   :  { %v533_v10 = vmax.f32 %v531_v61, %v532_v32  ;;  %v2223_v53 = vpop.permute.xlu0 %648 }
 0x208   :  { %1819 = vpush %v533_v10 }
 0x20d   :  { %v617_v12 = vpop.permute.xlu1 %616 }
 0x215   :  { %v630_v46 = vpop.permute.xlu1 %629 }
 0x216   :  { %v604_v51 = vpop.permute.xlu0 %603 }
 0x21d   :  { %v643_v13 = vpop.permute.xlu1 %642 }
 0x22d   :  { %v662_v60 = vpop.permute.xlu1 %661 }
 0x239   :  { %s1820_s15 = spop %1819 }
 0x23a   :  { %v2214_v36 = vstv %s1820_s15 }
 0x23b   :  { %v539_v16 = vsub.f32 %v500_v3, %v2214_v36  ;;  %v537_v37 = vsub.f32 %v498_v62, %v2214_v36  ;;  %v536_v38 = vsub.f32 %v497_v1, %v2214_v36  ;;  %v544_v43 = vsub.f32 %v505_v4, %v2214_v36 }
 0x23c   :  { %v540_v44 = vsub.f32 %v2183_v57, %v2214_v36  ;;  %v538_v45 = vsub.f32 %v499_v2, %v2214_v36  ;;  %v547_v59 = vsub.f32 %v2192_v7, %v2214_v36  ;;  %v542_v57 = vsub.f32 %v2185_v58, %v2214_v36 }
 0x23d   :  { %v558_v40 = vmul.f32 1.442695, %v539_v16  ;;  %v554_v41 = vmul.f32 1.442695, %v537_v37  ;;  %v552_v42 = vmul.f32 1.442695, %v536_v38  ;;  %v541_v4 = vsub.f32 %v2181_v55, %v2214_v36  ;;  %v636_v55 = vpop.permute.xlu2 %635 }
 0x23e   :  { %v568_v47 = vmul.f32 1.442695, %v544_v43  ;;  %v560_v48 = vmul.f32 1.442695, %v540_v44  ;;  %v556_v49 = vmul.f32 1.442695, %v538_v45  ;;  %v550_v20 = vsub.f32 %v2204_v19, %v2214_v36 }
 0x23f   :  { %1843 = vpow2.f32 %v558_v40  ;;  %v574_v6 = vmul.f32 1.442695, %v547_v59  ;;  %v564_v7 = vmul.f32 1.442695, %v542_v57  ;;  %v562_v58 = vmul.f32 1.442695, %v541_v4 }
 0x240   :  { %1845 = vpow2.f32 %v554_v41  ;;  %v545_v22 = vsub.f32 %v2189_v0, %v2214_v36  ;;  %v543_v25 = vsub.f32 %v2187_v63, %v2214_v36  ;;  %v580_v27 = vmul.f32 1.442695, %v550_v20 }
 0x241   :  { %1847 = vpow2.f32 %v552_v42  ;;  %v548_v31 = vsub.f32 %v2202_v18, %v2214_v36  ;;  %v546_v61 = vsub.f32 %v2194_v8, %v2214_v36  ;;  %v551_v37 = vsub.f32 %v2209_v23, %v2214_v36 }
 0x242   :  { %1849 = vpow2.f32 %v568_v47  ;;  %v570_v19 = vmul.f32 1.442695, %v545_v22  ;;  %v566_v29 = vmul.f32 1.442695, %v543_v25  ;;  %v549_v38 = vsub.f32 %v2196_v9, %v2214_v36 }
 0x243   :  { %1851 = vpow2.f32 %v560_v48  ;;  %v576_v33 = vmul.f32 1.442695, %v548_v31  ;;  %v582_v42 = vmul.f32 1.442695, %v551_v37  ;;  %v675_v48 = vpop.permute.xlu1 %674 }
 0x244   :  { %1853 = vpow2.f32 %v556_v49  ;;  %v578_v23 = vmul.f32 1.442695, %v549_v38 }
 0x245   :  { %v1844_v52 = vpop.eup %1843  ;;  %1855 = vpow2.f32 %v574_v6  ;;  %v656_v32 = vpop.permute.xlu2 %655 }
 0x246   :  { %v1846_v62 = vpop.eup %1845  ;;  %v2227_v1 = vmul.f32 %v1844_v52, %v610_v39  ;;  %1857 = vpow2.f32 %v564_v7 }
 0x247   :  { %v1848_v2 = vpop.eup %1847  ;;  %v2231_v3 = vmul.f32 %v1846_v62, %v597_v35  ;;  %1859 = vpow2.f32 %v562_v58  ;;  %v572_v35 = vmul.f32 1.442695, %v546_v61 }
 0x248   :  { %747 = vperm.xlu0 %1832, %v2227_v1   ;;  %v2236_v5 = vmul.f32 %v1848_v2, %v591_v34  ;;  %v1850_v11 = vpop.eup %1849  ;;  %1861 = vpow2.f32 %v580_v27  ;;  %v682_v34 = vpop.permute.xlu0 %681 }
 0x249   :  { %741 = vperm.xlu2 %1831, %v2231_v3   ;;  %v1852_v14 = vpop.eup %1851  ;;  %v2242_v21 = vmul.f32 %v1850_v11, %v643_v13  ;;  %1863 = vpow2.f32 %v570_v19  ;;  %v786_v13 = vand.u32 127, %v586_v54 }
 0x24a   :  { %738 = vperm.xlu1 %1830, %v2236_v5   ;;  %v1854_v17 = vpop.eup %1853  ;;  %v2246_v56 = vmul.f32 %v1852_v14, %v617_v12  ;;  %1865 = vpow2.f32 %v566_v29 }
 0x24b   :  { %v2250_v26 = vmul.f32 %v1854_v17, %v604_v51  ;;  %v1856_v28 = vpop.eup %1855  ;;  %1867 = vpow2.f32 %v576_v33  ;;  %v788_v14 = vadd.s32 4294967288, %v786_v13 }
 0x24c   :  { %v1858_v0 = vpop.eup %1857  ;;  %v2257_v63 = vmul.f32 %v1856_v28, %v662_v60  ;;  %1869 = vpow2.f32 %v572_v35 }
 0x24d   :  { %v1860_v30 = vpop.eup %1859  ;;  %v2259_v24 = vmul.f32 %v1858_v0, %v630_v46  ;;  %v669_v41 = vpop.permute.xlu2 %668  ;;  %1871 = vpow2.f32 %v582_v42 }
 0x24e   :  { %v2264_v10 = vmul.f32 %v1860_v30, %v623_v50  ;;  %v1862_v18 = vpop.eup %1861  ;;  %1873 = vpow2.f32 %v578_v23 }
 0x24f   :  { %v1864_v12 = vpop.eup %1863  ;;  %v2270_v8 = vmul.f32 %v1862_v18, %v682_v34 }
 0x250   :  { %762 = vperm.xlu0 %1832, %v2242_v21   ;;  %v1866_v16 = vpop.eup %1865  ;;  %v2275_v39 = vmul.f32 %v1864_v12, %v2223_v53 }
 0x251   :  { %750 = vperm.xlu2 %1831, %v2246_v56   ;;  %v2277_v40 = vmul.f32 %v1866_v16, %v636_v55  ;;  %v1868_v43 = vpop.eup %1867 }
 0x252   :  { %744 = vperm.xlu1 %1830, %v2250_v26   ;;  %v1870_v44 = vpop.eup %1869  ;;  %v2282_v45 = vmul.f32 %v1868_v43, %v669_v41 }
 0x253   :  { %v2284_v9 = vmul.f32 %v1870_v44, %v656_v32  ;;  %v1872_v36 = vpop.eup %1871 }
 0x254   :  { %v1874_v47 = vpop.eup %1873 }
 0x255   :  { %v688_v46 = vpop.permute.xlu2 %687  ;;  %v2290_v50 = vmul.f32 %v1874_v47, %v675_v48 }
 0x256   :  { %v2288_v49 = vmul.f32 %v1872_v36, %v688_v46 }
 0x258   :  { %771 = vperm.xlu0 %1832, %v2257_v63  }
 0x259   :  { %756 = vperm.xlu2 %1831, %v2259_v24  }
 0x25a   :  { %753 = vperm.xlu1 %1830, %v2264_v10  }
 0x260   :  { %780 = vperm.xlu0 %1832, %v2270_v8  }
 0x261   :  { %765 = vperm.xlu2 %1831, %v2275_v39  }
 0x262   :  { %759 = vperm.xlu1 %1830, %v2277_v40  }
 0x269   :  { %774 = vperm.xlu2 %1831, %v2282_v45  }
 0x26a   :  { %768 = vperm.xlu1 %1830, %v2284_v9  }
 0x271   :  { %783 = vperm.xlu2 %1831, %v2288_v49  }
 0x272   :  { %777 = vperm.xlu1 %1830, %v2290_v50  }
 0x2a3   :  { %v742_v52 = vpop.permute.xlu2 %741 }
 0x2a4   :  { %v789_v28 = vperm.slane %v742_v52, %v788_v14 }
 0x2ab   :  { %v751_v53 = vpop.permute.xlu2 %750 }
 0x2ac   :  { %v795_v19 = vperm.slane %v751_v53, %v786_v13 }
 0x2b3   :  { %v757_v2 = vpop.permute.xlu2 %756 }
 0x2b4   :  { %v798_v29 = vperm.slane %v757_v2, %v786_v13 }
 0x2ba   :  { %v748_v62 = vpop.permute.xlu0 %747 }
 0x2bb   :  { %v766_v7 = vpop.permute.xlu2 %765  ;;  %v793_v51 = vperm.slane %v748_v62, %v788_v14 }
 0x2bc   :  { %v739_v59 = vpop.permute.xlu1 %738  ;;  %v802_v35 = vperm.slane %v766_v7, %v788_v14 }
 0x2bd   :  { %v787_v22 = vperm.slane %v739_v59, %v786_v13 }
 0x2bf   :  { %v791_v54 = vsel %vm790_vm0, %v789_v28, %v787_v22 }
 0x2c2   :  { %v763_v6 = vpop.permute.xlu0 %762 }
 0x2c3   :  { %v775_v17 = vpop.permute.xlu2 %774  ;;  %v801_v32 = vperm.slane %v763_v6, %v786_v13 }
 0x2c4   :  { %v745_v57 = vpop.permute.xlu1 %744  ;;  %v807_v42 = vperm.slane %v775_v17, %v786_v13 }
 0x2c5   :  { %v792_v20 = vperm.slane %v745_v57, %v786_v13  ;;  %v803_v23 = vsel %vm790_vm0, %v802_v35, %v801_v32 }
 0x2c7   :  { %v794_v0 = vsel %vm790_vm0, %v793_v51, %v792_v20 }
 0x2c8   :  { %v814_v61 = vsel %vm813_vm1, %v794_v0, %v791_v54 }
 0x2ca   :  { %v772_v58 = vpop.permute.xlu0 %771 }
 0x2cb   :  { %v805_v34 = vperm.slane %v772_v58, %v788_v14  ;;  %v784_v12 = vpop.permute.xlu2 %783 }
 0x2cc   :  { %v754_v4 = vpop.permute.xlu1 %753  ;;  %v811_v44 = vperm.slane %v784_v12, %v788_v14 }
 0x2cd   :  { %v796_v55 = vperm.slane %v754_v4, %v788_v14 }
 0x2cf   :  { %v797_v30 = vsel %vm790_vm0, %v796_v55, %v795_v19 }
 0x2d0   :  { %v816_v18 = vsel %vm815_vm2, %v797_v30, %v814_v61 }
 0x2d2   :  { %v781_v33 = vpop.permute.xlu0 %780 }
 0x2d3   :  { %v810_v37 = vperm.slane %v781_v33, %v786_v13 }
 0x2d4   :  { %v760_v11 = vpop.permute.xlu1 %759 }
 0x2d5   :  { %v799_v25 = vperm.slane %v760_v11, %v788_v14  ;;  %v812_v48 = vsel %vm790_vm0, %v811_v44, %v810_v37 }
 0x2d7   :  { %v800_v60 = vsel %vm790_vm0, %v799_v25, %v798_v29 }
 0x2d8   :  { %v818_v16 = vsel %vm817_vm3, %v800_v60, %v816_v18 }
 0x2d9   :  { %v820_v36 = vsel %vm819_vm4, %v803_v23, %v818_v16 }
 0x2dc   :  { %v769_v27 = vpop.permute.xlu1 %768 }
 0x2dd   :  { %v804_v31 = vperm.slane %v769_v27, %v786_v13 }
 0x2df   :  { %v806_v38 = vsel %vm790_vm0, %v805_v34, %v804_v31 }
 0x2e0   :  { %v822_v47 = vsel %vm821_vm5, %v806_v38, %v820_v36 }
 0x2e4   :  { %v778_v41 = vpop.permute.xlu1 %777 }
 0x2e5   :  { %v808_v43 = vperm.slane %v778_v41, %v788_v14 }
 0x2e7   :  { %v809_v46 = vsel %vm790_vm0, %v808_v43, %v807_v42 }
 0x2e8   :  { %v824_v52 = vsel %vm823_vm6, %v809_v46, %v822_v47 }
 0x2e9   :  { %v826_v53 = vsel %vm825_vm7, %v812_v48, %v824_v52 }
 0x2ea   :  { %v829_v59 = vsel %vm828_vm8, %v826_v53, 0.0 }
 0x2eb   :  { %830 = vadd.xlane.f32.xlu1 %v829_v59 }
 0x35e   :  { %v831_v62 = vpop.xlane.xlu1 %830 }
 0x35f   :  { %v2310_v57 = vadd.f32 1e-05, %v831_v62 }
 0x361   :  { %v839_v2 = vperm.slane %v2310_v57, 5  ;;  %v834_v4 = vperm.slane %v2310_v57, 0  ;;  %v835_v6 = vperm.slane %v2310_v57, 1  ;;  %v2316_v7 = vperm.slane %v2310_v57, 2 }
 0x362   :  { %v2320_v14 = vperm.slane %v2310_v57, 3  ;;  %v2328_v32 = vperm.slane %v2310_v57, 4 }
 0x363   :  { %1875 = vrcp.f32 %v839_v2  ;;  %v939_v22 = vand.u32 2147483647, %v839_v2  ;;  %v941_v27 = vand.u32 2147483648, %v839_v2  ;;  %v859_v28 = vand.u32 2147483647, %v834_v4 }
 0x364   :  { %1877 = vrcp.f32 %v834_v4  ;;  %v861_v29 = vand.u32 2147483648, %v834_v4  ;;  %vm935_vm11 = vweird.f32 %v839_v2  ;;  %vm855_vm14 = vweird.f32 %v834_v4 }
 0x365   :  { %1879 = vrcp.f32 %v835_v6  ;;  %vm940_vm13 = vcmp.eq.f32.partialorder %v939_v22, 8.507059e+37  ;;  %v942_v33 = vor.u32 1.1754944e-38, %v941_v27  ;;  %vm860_vm0 = vcmp.eq.f32.partialorder %v859_v28, 8.507059e+37 }
 0x366   :  { %1881 = vrcp.f32 %v2316_v7  ;;  %v862_v35 = vor.u32 1.1754944e-38, %v861_v29  ;;  %v877_v43 = vand.u32 2147483648, %v835_v6  ;;  %v875_v46 = vand.u32 2147483647, %v835_v6 }
 0x367   :  { %1883 = vrcp.f32 %v2320_v14 }
 0x368   :  { %1885 = vrcp.f32 %v2328_v32 }
 0x369   :  { %v1876_v11 = vpop.eup %1875 }
 0x36a   :  { %v1878_v13 = vpop.eup %1877  ;;  %v931_v58 = vmul.f32 %v1876_v11, %v839_v2  ;;  %vm936_vm9 = vweird.f32 %v1876_v11  ;;  %v893_v2 = vand.u32 2147483648, %v2316_v7 }
 0x36b   :  { %v1880_v17 = vpop.eup %1879  ;;  %v851_v20 = vmul.f32 %v1878_v13, %v834_v4  ;;  %vm856_vm10 = vweird.f32 %v1878_v13  ;;  %vm937_vm12 = vmor %vm935_vm11, %vm936_vm9  ;;  %vm871_vm9 = vweird.f32 %v835_v6  ;;  %vm876_vm11 = vcmp.eq.f32.partialorder %v875_v46, 8.507059e+37 }
 0x36c   :  { %v932_v55 = vsub.f32 1.0, %v931_v58  ;;  %v867_v51 = vmul.f32 %v1880_v17, %v835_v6  ;;  %v2322_v25 = vpop.eup %1881  ;;  %vm857_vm15 = vmor %vm855_vm14, %vm856_vm10  ;;  %vm872_vm8 = vweird.f32 %v1880_v17 }
 0x36d   :  { %v852_v19 = vsub.f32 1.0, %v851_v20  ;;  %v883_v60 = vmul.f32 %v2322_v25, %v2316_v7  ;;  %v1884_v41 = vpop.eup %1883  ;;  %vm873_vm10 = vmor %vm871_vm9, %vm872_vm8  ;;  %v894_v20 = vor.u32 1.1754944e-38, %v893_v2  ;;  %vm903_vm8 = vweird.f32 %v2320_v14 }
 0x36e   :  { %v933_v0 = vmul.f32 %v1876_v11, %v932_v55  ;;  %v868_v30 = vsub.f32 1.0, %v867_v51  ;;  %v899_v52 = vmul.f32 %v1884_v41, %v2320_v14  ;;  %v1886_v62 = vpop.eup %1885  ;;  %v909_v51 = vand.u32 2147483648, %v2320_v14 }
 0x36f   :  { %v853_v54 = vmul.f32 %v1878_v13, %v852_v19  ;;  %v884_v38 = vsub.f32 1.0, %v883_v60  ;;  %v925_v60 = vand.u32 2147483648, %v2328_v32 }
 0x370   :  { %v934_v31 = vadd.f32 %v1876_v11, %v933_v0  ;;  %v869_v61 = vmul.f32 %v1880_v17, %v868_v30  ;;  %v900_v59 = vsub.f32 1.0, %v899_v52  ;;  %v910_v0 = vor.u32 1.1754944e-38, %v909_v51 }
 0x371   :  { %v854_v18 = vadd.f32 %v1878_v13, %v853_v54  ;;  %v885_v48 = vmul.f32 %v2322_v25, %v884_v38 }
 0x372   :  { %v938_v34 = vsel %vm937_vm12, %v1876_v11, %v934_v31  ;;  %v870_v37 = vadd.f32 %v1880_v17, %v869_v61  ;;  %vm888_vm12 = vweird.f32 %v2322_v25  ;;  %v891_v11 = vand.u32 2147483647, %v2316_v7 }
 0x373   :  { %v2330_v12 = vsel %vm940_vm13, %v942_v33, %v938_v34  ;;  %v858_v16 = vsel %vm857_vm15, %v1878_v13, %v854_v18  ;;  %vm887_vm13 = vweird.f32 %v2316_v7  ;;  %v901_v58 = vmul.f32 %v1884_v41, %v900_v59 }
 0x374   :  { %v944_v42 = vmul.f32 %v2330_v12, %v2284_v9  ;;  %v863_v23 = vsel %vm860_vm0, %v862_v35, %v858_v16  ;;  %v874_v47 = vsel %vm873_vm10, %v1880_v17, %v870_v37  ;;  %v878_v9 = vor.u32 1.1754944e-38, %v877_v43  ;;  %vm889_vm14 = vmor %vm887_vm13, %vm888_vm12 }
 0x375   :  { %v865_v44 = vmul.f32 %v863_v23, %v2231_v3  ;;  %v864_v36 = vmul.f32 %v863_v23, %v2236_v5  ;;  %v2340_v3 = vperm.slane %v2310_v57, 6  ;;  %v886_v5 = vadd.f32 %v2322_v25, %v885_v48 }
 0x376   :  { %1030 = vperm.xlu1 %1830, %v944_v42   ;;  %v879_v53 = vsel %vm876_vm11, %v878_v9, %v874_v47  ;;  %v915_v17 = vmul.f32 %v1886_v62, %v2328_v32  ;;  %vm892_vm15 = vcmp.eq.f32.partialorder %v891_v11, 8.507059e+37  ;;  %vm904_vm0 = vweird.f32 %v1884_v41  ;;  %v1891_v11 = vld [vmem:[%s2525_s0 + $0x10] sm:$0xff] }
 0x377   :  { %985 = vperm.xlu2 %1831, %v865_v44   ;;  %980 = vperm.xlu0 %1832, %v864_v36   ;;  %v881_v4 = vmul.f32 %v879_v53, %v2227_v1  ;;  %v880_v6 = vmul.f32 %v879_v53, %v2250_v26  ;;  %1887 = vrcp.f32 %v2340_v3  ;;  %v890_v13 = vsel %vm889_vm14, %v2322_v25, %v886_v5  ;;  %vm905_vm9 = vmor %vm903_vm8, %vm904_vm0 }
 0x378   :  { %v895_v55 = vsel %vm892_vm15, %v894_v20, %v890_v13  ;;  %v2353_v1 = vperm.slane %v2310_v57, 7  ;;  %v902_v26 = vadd.f32 %v1884_v41, %v901_v58  ;;  %v916_v22 = vsub.f32 1.0, %v915_v17  ;;  %v1894_v20 = vld [vmem:[%s2525_s0 + $0x18] sm:$0xff] }
 0x379   :  { %v897_v27 = vmul.f32 %v895_v55, %v2264_v10  ;;  %v896_v19 = vmul.f32 %v895_v55, %v2246_v56  ;;  %v907_v25 = vand.u32 2147483647, %v2320_v14  ;;  %vm920_vm11 = vweird.f32 %v1886_v62 }
 0x37a   :  { %1889 = vrcp.f32 %v2353_v1  ;;  %v906_v57 = vsel %vm905_vm9, %v1884_v41, %v902_v26  ;;  %v917_v28 = vmul.f32 %v1886_v62, %v916_v22  ;;  %vm919_vm12 = vweird.f32 %v2328_v32  ;;  %v1895_v26 = vld [vmem:[%s2525_s0 + $0x30] sm:$0xff] }
 0x37b   :  { %vm908_vm10 = vcmp.eq.f32.partialorder %v907_v25, 8.507059e+37  ;;  %v923_v61 = vand.u32 2147483647, %v2328_v32  ;;  %vm921_vm13 = vmor %vm919_vm12, %vm920_vm11  ;;  %v926_v35 = vor.u32 1.1754944e-38, %v925_v60  ;;  %vm951_vm0 = vweird.f32 %v2340_v3  ;;  %v1898_v25 = vld [vmem:[%s2525_s0 + $0x40] sm:$0xff] }
 0x37c   :  { %v911_v30 = vsel %vm908_vm10, %v910_v0, %v906_v57  ;;  %v918_v54 = vadd.f32 %v1886_v62, %v917_v28  ;;  %v955_v32 = vand.u32 2147483647, %v2340_v3  ;;  %v973_v46 = vand.u32 2147483648, %v2353_v1  ;;  %v1899_v28 = vld [vmem:[%s2525_s0 + $0x38] sm:$0xff] }
 0x37d   :  { %v1888_v7 = vpop.eup %1887  ;;  %v913_v14 = vmul.f32 %v911_v30, %v2277_v40  ;;  %v912_v31 = vmul.f32 %v911_v30, %v2259_v24  ;;  %vm924_vm14 = vcmp.eq.f32.partialorder %v923_v61, 8.507059e+37  ;;  %v957_v40 = vand.u32 2147483648, %v2340_v3  ;;  %v1784_v30 = vld [vmem:[%s2527_s2 + $0xb8] sm:$0xff] }
 0x37e   :  { %v947_v29 = vmul.f32 %v1888_v7, %v2340_v3  ;;  %v922_v33 = vsel %vm921_vm13, %v1886_v62, %v918_v54  ;;  %vm952_vm15 = vweird.f32 %v1888_v7  ;;  %vm956_vm9 = vcmp.eq.f32.partialorder %v955_v32, 8.507059e+37  ;;  %1230 = vmatpush.bf16.msra.mxu1 %v1784_v30 }
 0x37f   :  { %995 = vperm.xlu2 %1831, %v881_v4   ;;  %990 = vperm.xlu0 %1832, %v880_v6   ;;  %v927_v16 = vsel %vm924_vm14, %v926_v35, %v922_v33  ;;  %vm953_vm8 = vmor %vm951_vm0, %vm952_vm15  ;;  %v958_v43 = vor.u32 1.1754944e-38, %v957_v40  ;;  %vm967_vm11 = vweird.f32 %v2353_v1  ;;  %v971_v47 = vand.u32 2147483647, %v2353_v1 }
 0x380   :  { %v948_v10 = vsub.f32 1.0, %v947_v29  ;;  %v1890_v56 = vpop.eup %1889  ;;  %v929_v24 = vmul.f32 %v927_v16, %v2275_v39  ;;  %v928_v41 = vmul.f32 %v927_v16, %v2242_v21  ;;  %v945_v21 = vmul.f32 %v2330_v12, %v2257_v63 }
 0x381   :  { %v963_v34 = vmul.f32 %v1890_v56, %v2353_v1  ;;  %vm968_vm10 = vweird.f32 %v1890_v56  ;;  %v974_v52 = vor.u32 1.1754944e-38, %v973_v46  ;;  %vm972_vm13 = vcmp.eq.f32.partialorder %v971_v47, 8.507059e+37  ;;  %v1781_v47 = vld [vmem:[%s2527_s2 + $0xa0] sm:$0xff] }
 0x382   :  { %v949_v18 = vmul.f32 %v1888_v7, %v948_v10  ;;  %vm969_vm12 = vmor %vm967_vm11, %vm968_vm10  ;;  %v1900_v10 = vld [vmem:[%s2525_s0 + $0x48] sm:$0xff] }
 0x383   :  { %v964_v38 = vsub.f32 1.0, %v963_v34 }
 0x384   :  { %v950_v37 = vadd.f32 %v1888_v7, %v949_v18 }
 0x385   :  { %v965_v23 = vmul.f32 %v1890_v56, %v964_v38 }
 0x386   :  { %v954_v42 = vsel %vm953_vm8, %v1888_v7, %v950_v37  ;;  %v1896_v7 = vld [vmem:[%s2525_s0 + $0x8] sm:$0xff]  ;;  %v1901_v37 = vld [vmem:[%s2525_s0 + $0x50] sm:$0xff] }
 0x387   :  { %1005 = vperm.xlu2 %1831, %v897_v27   ;;  %1000 = vperm.xlu0 %1832, %v896_v19   ;;  %v959_v44 = vsel %vm956_vm9, %v958_v43, %v954_v42  ;;  %v966_v36 = vadd.f32 %v1890_v56, %v965_v23  ;;  %v1897_v27 = vld [vmem:[%s2525_s0 + $0x28] sm:$0xff] }
 0x388   :  { %v960_v39 = vmul.f32 %v959_v44, %v2282_v45  ;;  %v961_v3 = vmul.f32 %v959_v44, %v2290_v50  ;;  %v1892_v50 = vld [vmem:[%s2525_s0] sm:$0xff]  ;;  %v1782_v43 = vld [vmem:[%s2527_s2 + $0xa8] sm:$0xff] }
 0x389   :  { %v970_v48 = vsel %vm969_vm12, %v1890_v56, %v966_v36 }
 0x38a   :  { %v975_v9 = vsel %vm972_vm13, %v974_v52, %v970_v48 }
 0x38b   :  { %v976_v53 = vmul.f32 %v975_v9, %v2270_v8  ;;  %v977_v45 = vmul.f32 %v975_v9, %v2288_v49  ;;  %v1893_v49 = vld [vmem:[%s2525_s0 + $0x20] sm:$0xff] }
 0x38f   :  { %1015 = vperm.xlu2 %1831, %v913_v14   ;;  %1010 = vperm.xlu0 %1832, %v912_v31   ;;  %v1783_v31 = vld [vmem:[%s2527_s2 + $0xb0] sm:$0xff] }
 0x390   :  { %1231 = vmatpush.bf16.msra.mxu1 %v1783_v31 }
 0x394   :  { %1232 = vmatpush.bf16.msra.mxu1 %v1782_v43 }
 0x397   :  { %1025 = vperm.xlu2 %1831, %v929_v24   ;;  %1020 = vperm.xlu0 %1832, %v928_v41   ;;  %v1902_v24 = vld [vmem:[%s2525_s0 + $0x58] sm:$0xff] }
 0x398   :  { %1233 = vmatpush.bf16.msra.mxu1 %v1781_v47  ;;  %v1787_v47 = vld [vmem:[%s2527_s2 + $0xd0] sm:$0xff] }
 0x39f   :  { %1040 = vperm.xlu2 %1831, %v960_v39   ;;  %1035 = vperm.xlu0 %1832, %v945_v21  }
 0x3a7   :  { %1050 = vperm.xlu2 %1831, %v976_v53   ;;  %1045 = vperm.xlu0 %1832, %v961_v3  }
 0x3af   :  { %1055 = vperm.xlu0 %1832, %v977_v45  }
 0x3d1   :  { %v986_v63 = vpop.permute.xlu2 %985 }
 0x3d2   :  { %v1059_v51 = vmul.f32 %v1896_v7, %v986_v63  ;;  %v1792_v63 = vld [vmem:[%s2527_s2 + $0xf8] sm:$0xff] }
 0x3d3   :  { %1313 = vmatpush.bf16.msra.mxu2 %v1792_v63 }
 0x3d9   :  { %v996_v5 = vpop.permute.xlu2 %995 }
 0x3da   :  { %v1061_v55 = vmul.f32 %v1894_v20, %v996_v5 }
 0x3e1   :  { %v1006_v62 = vpop.permute.xlu2 %1005 }
 0x3e2   :  { %v1063_v19 = vmul.f32 %v1897_v27, %v1006_v62  ;;  %v1904_v62 = vld [vmem:[%s2525_s0 + $0x68] sm:$0xff] }
 0x3e8   :  { %v1031_v61 = vpop.permute.xlu1 %1030 }
 0x3e9   :  { %v981_v12 = vpop.permute.xlu0 %980  ;;  %v1016_v4 = vpop.permute.xlu2 %1015  ;;  %v1068_v38 = vmul.f32 %v1901_v37, %v1031_v61 }
 0x3ea   :  { %v1058_v13 = vmul.f32 %v1892_v50, %v981_v12  ;;  %v1065_v29 = vmul.f32 %v1899_v28, %v1016_v4  ;;  %v1903_v12 = vld [vmem:[%s2525_s0 + $0x60] sm:$0xff]  ;;  %v1780_v4 = vld [vmem:[%s2527_s2 + $0x98] sm:$0xff]  ;;  %v1905_v28 = vld [vmem:[%s2525_s0 + $0x70] sm:$0xff] }
 0x3eb   :  { %1234 = vmatpush.bf16.msra.mxu1 %v1780_v4 }
 0x3ec   :  { %v1074_v54 = vadd.f32 %v1059_v51, %v1058_v13 }
 0x3ee   :  { %v1075_v34 = vrot.slane %v1074_v54, 4 }
 0x3f0   :  { %v1076_v44 = vadd.f32 %v1075_v34, %v1074_v54  ;;  %v1906_v54 = vld [vmem:[%s2525_s0 + $0x78] sm:$0xff] }
 0x3f1   :  { %v991_v59 = vpop.permute.xlu0 %990  ;;  %v1026_v1 = vpop.permute.xlu2 %1025 }
 0x3f2   :  { %v1060_v8 = vmul.f32 %v1891_v11, %v991_v59  ;;  %v1067_v56 = vmul.f32 %v1900_v10, %v1026_v1  ;;  %v1077_v53 = vrot.slane %v1076_v44, 2  ;;  %v1791_v11 = vld [vmem:[%s2527_s2 + $0xf0] sm:$0xff] }
 0x3f3   :  { %1314 = vmatpush.bf16.msra.mxu2 %v1791_v11 }
 0x3f4   :  { %v1081_v0 = vadd.f32 %v1061_v55, %v1060_v8  ;;  %v1779_v55 = vld [vmem:[%s2527_s2 + $0x90] sm:$0xff] }
 0x3f5   :  { %1235 = vmatpush.bf16.msra.mxu1 %v1779_v55  ;;  %v1786_v55 = vld [vmem:[%s2527_s2 + $0xc8] sm:$0xff] }
 0x3f6   :  { %v1082_v18 = vrot.slane %v1081_v0, 4 }
 0x3f8   :  { %v1083_v42 = vadd.f32 %v1082_v18, %v1081_v0 }
 0x3f9   :  { %v1001_v2 = vpop.permute.xlu0 %1000  ;;  %v1041_v36 = vpop.permute.xlu2 %1040 }
 0x3fa   :  { %v1062_v58 = vmul.f32 %v1893_v49, %v1001_v2  ;;  %v1084_v52 = vrot.slane %v1083_v42, 2  ;;  %v1070_v5 = vmul.f32 %v1903_v12, %v1041_v36  ;;  %v1078_v49 = vadd.f32 %v1077_v53, %v1076_v44 }
 0x3fc   :  { %v1088_v60 = vadd.f32 %v1063_v19, %v1062_v58  ;;  %v1085_v8 = vadd.f32 %v1084_v52, %v1083_v42  ;;  %v1079_v19 = vrot.slane %v1078_v49, 1 }
 0x3fe   :  { %v1089_v35 = vrot.slane %v1088_v60, 4  ;;  %v1086_v7 = vrot.slane %v1085_v8, 1 }
 0x400   :  { %v1090_v46 = vadd.f32 %v1089_v35, %v1088_v60  ;;  %v1087_v31 = vadd.f32 %v1086_v7, %v1085_v8  ;;  %v1080_v35 = vadd.f32 %v1079_v19, %v1078_v49  ;;  %v1798_v7 = vld [vmem:[%s2527_s2 + $0x128] sm:$0xff]  ;;  %v1837_v19 = vld [vmem:[%s2526_s1 + $0x13] ss:$0 sm:$0xff] }
 0x401   :  { %v1011_v6 = vpop.permute.xlu0 %1010  ;;  %v1051_v1 = vpop.permute.xlu2 %1050 }
 0x402   :  { %v1064_v22 = vmul.f32 %v1895_v26, %v1011_v6  ;;  %v1091_v3 = vrot.slane %v1090_v46, 2  ;;  %v1130_v36 = vpack.c.bf16 %v1080_v35, %v1080_v35 }
 0x404   :  { %v1095_v14 = vadd.f32 %v1065_v29, %v1064_v22  ;;  %v1092_v58 = vadd.f32 %v1091_v3, %v1090_v46  ;;  %v1790_v22 = vld [vmem:[%s2527_s2 + $0xe8] sm:$0xff]  ;;  %v1072_v29 = vmul.f32 %v1905_v28, %v1051_v1  ;;  %v1785_v1 = vld [vmem:[%s2527_s2 + $0xc0] sm:$0xff]  ;;  %v413_v28 = vadd.f32 %v1837_v19, %v2120_v15  ;;  %v1839_v15 = vld [vmem:[%s2526_s1 + $0x15] ss:$0 sm:$0xff] }
 0x405   :  { %1315 = vmatpush.bf16.msra.mxu2 %v1790_v22  ;;  %v1799_v22 = vld [vmem:[%s2527_s2 + $0x130] sm:$0xff] }
 0x406   :  { %v1096_v40 = vrot.slane %v1095_v14, 4 }
 0x408   :  { %v1097_v39 = vadd.f32 %v1096_v40, %v1095_v14  ;;  %v1789_v14 = vld [vmem:[%s2527_s2 + $0xe0] sm:$0xff] }
 0x409   :  { %v1021_v17 = vpop.permute.xlu0 %1020  ;;  %v1777_v40 = vld [vmem:[%s2527_s2 + $0x80] sm:$0xff]  ;;  %1316 = vmatpush.bf16.msra.mxu2 %v1789_v14  ;;  %v1794_v14 = vld [vmem:[%s2527_s2 + $0x108] sm:$0xff] }
 0x40a   :  { %v1066_v57 = vmul.f32 %v1898_v25, %v1021_v17  ;;  %v1098_v59 = vrot.slane %v1097_v39, 2  ;;  %v1093_v25 = vrot.slane %v1092_v58, 1 }
 0x40c   :  { %v1102_v33 = vadd.f32 %v1067_v56, %v1066_v57  ;;  %v1099_v17 = vadd.f32 %v1098_v59, %v1097_v39  ;;  %v1778_v56 = vld [vmem:[%s2527_s2 + $0x88] sm:$0xff]  ;;  %v1094_v34 = vadd.f32 %v1093_v25, %v1092_v58  ;;  %v1795_v25 = vld [vmem:[%s2527_s2 + $0x110] sm:$0xff] }
 0x40d   :  { %1236 = vmatpush.bf16.msra.mxu1 %v1778_v56 }
 0x40e   :  { %v1103_v32 = vrot.slane %v1102_v33, 4  ;;  %v1100_v0 = vrot.slane %v1099_v17, 1  ;;  %v1132_v43 = vpack.c.bf16 %v1094_v34, %v1094_v34 }
 0x410   :  { %v1104_v48 = vadd.f32 %v1103_v32, %v1102_v33  ;;  %v1131_v32 = vpack.c.bf16 %v1087_v31, %v1087_v31  ;;  %v1167_v53 = vunpack.c.l.b16 %v1132_v43  ;;  %v1793_v31 = vld [vmem:[%s2527_s2 + $0x100] sm:$0xff] }
 0x411   :  { %v1036_v16 = vpop.permute.xlu0 %1035  ;;  %1237 = vmatpush.bf16.msra.mxu1 %v1777_v40 }
 0x412   :  { %v1069_v41 = vmul.f32 %v1902_v24, %v1036_v16  ;;  %v1105_v6 = vrot.slane %v1104_v48, 2  ;;  %v1101_v16 = vadd.f32 %v1100_v0, %v1099_v17 }
 0x414   :  { %v1109_v23 = vadd.f32 %v1069_v41, %v1068_v38  ;;  %v1106_v26 = vadd.f32 %v1105_v6, %v1104_v48  ;;  %v1788_v41 = vld [vmem:[%s2527_s2 + $0xd8] sm:$0xff]  ;;  %v1133_v46 = vpack.c.bf16 %v1101_v16, %v1101_v16  ;;  %v1166_v48 = vunpack.c.l.b16 %v1131_v32  ;;  %v1840_v16 = vld [vmem:[%s2526_s1 + $0x16] ss:$0 sm:$0xff] }
 0x415   :  { %1317 = vmatpush.bf16.msra.mxu2 %v1788_v41 }
 0x416   :  { %v1110_v21 = vrot.slane %v1109_v23, 4  ;;  %v1107_v60 = vrot.slane %v1106_v26, 1  ;;  %v1168_v63 = vunpack.c.l.b16 %v1133_v46 }
 0x418   :  { %v1111_v9 = vadd.f32 %v1110_v21, %v1109_v23  ;;  %v1108_v24 = vadd.f32 %v1107_v60, %v1106_v26  ;;  %v1800_v26 = vld [vmem:[%s2527_s2 + $0x138] sm:$0xff] }
 0x419   :  { %v1046_v45 = vpop.permute.xlu0 %1045  ;;  %1318 = vmatpush.bf16.msra.mxu2 %v1787_v47  ;;  %1395 = vmatpush.bf16.msrb.mxu3 %v1800_v26 }
 0x41a   :  { %v1071_v2 = vmul.f32 %v1904_v62, %v1046_v45  ;;  %v1112_v50 = vrot.slane %v1111_v9, 2  ;;  %v1134_v21 = vpack.c.bf16 %v1108_v24, %v1108_v24  ;;  %v1165_v45 = vunpack.c.l.b16 %v1130_v36 }
 0x41c   :  { %v1116_v13 = vadd.f32 %v1071_v2, %v1070_v5  ;;  %v1113_v51 = vadd.f32 %v1112_v50, %v1111_v9  ;;  %v1169_v5 = vunpack.c.l.b16 %v1134_v21  ;;  %v1173_v59 = vsel %vm813_vm1, %v1166_v48, %v1165_v45 }
 0x41d   :  { %v1174_v4 = vsel %vm815_vm2, %v1167_v53, %v1173_v59  ;;  %1319 = vmatpush.bf16.msra.mxu2 %v1786_v55  ;;  %1396 = vmatpush.bf16.msrb.mxu3 %v1799_v22 }
 0x41e   :  { %v1117_v20 = vrot.slane %v1116_v13, 4  ;;  %v1114_v61 = vrot.slane %v1113_v51, 1  ;;  %v1175_v11 = vsel %vm817_vm3, %v1168_v63, %v1174_v4 }
 0x41f   :  { %v1176_v50 = vsel %vm819_vm4, %v1169_v5, %v1175_v11 }
 0x420   :  { %v1118_v27 = vadd.f32 %v1117_v20, %v1116_v13  ;;  %v1115_v42 = vadd.f32 %v1114_v61, %v1113_v51  ;;  %v1797_v51 = vld [vmem:[%s2527_s2 + $0x120] sm:$0xff] }
 0x421   :  { %v1056_v57 = vpop.permute.xlu0 %1055  ;;  %1320 = vmatpush.bf16.msra.mxu2 %v1785_v1  ;;  %1397 = vmatpush.bf16.msrb.mxu3 %v1798_v7 }
 0x422   :  { %v1119_v30 = vrot.slane %v1118_v27, 2  ;;  %v1073_v10 = vmul.f32 %v1906_v54, %v1056_v57  ;;  %v1135_v52 = vpack.c.bf16 %v1115_v42, %v1115_v42  ;;  %v1838_v57 = vld [vmem:[%s2526_s1 + $0x14] ss:$0 sm:$0xff] }
 0x424   :  { %v1120_v33 = vadd.f32 %v1119_v30, %v1118_v27  ;;  %v1123_v18 = vadd.f32 %v1073_v10, %v1072_v29  ;;  %v1170_v62 = vunpack.c.l.b16 %v1135_v52  ;;  %v1796_v27 = vld [vmem:[%s2527_s2 + $0x118] sm:$0xff]  ;;  %v416_v30 = vmax.f32 %v413_v28, 0.0  ;;  %s1416_s2 = sshll.u32 %s2528_s3, 4  ;;  %s1417_s2 = int_to_ptr.hbm [resolvable:$true] %s1416_s2 }
 0x425   :  { %1398 = vmatpush.bf16.msrb.mxu3 %v1797_v51 }
 0x426   :  { %v1121_v37 = vrot.slane %v1120_v33, 1  ;;  %v1124_v38 = vrot.slane %v1123_v18, 4  ;;  %v1177_v49 = vsel %vm821_vm5, %v1170_v62, %v1176_v50 }
 0x428   :  { %v1125_v23 = vadd.f32 %v1124_v38, %v1123_v18  ;;  %v1122_v44 = vadd.f32 %v1121_v37, %v1120_v33 }
 0x429   :  { %1399 = vmatpush.bf16.msrb.mxu3 %v1796_v27 }
 0x42a   :  { %v1126_v39 = vrot.slane %v1125_v23, 2  ;;  %v1136_v3 = vpack.c.bf16 %v1122_v44, %v1122_v44 }
 0x42c   :  { %v1127_v9 = vadd.f32 %v1126_v39, %v1125_v23  ;;  %v1171_v6 = vunpack.c.l.b16 %v1136_v3 }
 0x42d   :  { %1400 = vmatpush.bf16.msrb.mxu3 %v1795_v25 }
 0x42e   :  { %v1128_v12 = vrot.slane %v1127_v9, 1  ;;  %v1178_v58 = vsel %vm823_vm6, %v1171_v6, %v1177_v49 }
 0x430   :  { %v1129_v2 = vadd.f32 %v1128_v12, %v1127_v9 }
 0x431   :  { %1401 = vmatpush.bf16.msrb.mxu3 %v1794_v14 }
 0x432   :  { %v1137_v8 = vpack.c.bf16 %v1129_v2, %v1129_v2 }
 0x434   :  { %v1172_v13 = vunpack.c.l.b16 %v1137_v8 }
 0x435   :  { %1402 = vmatpush.bf16.msrb.mxu3 %v1793_v31 }
 0x436   :  { %v1179_v17 = vsel %vm825_vm7, %v1172_v13, %v1178_v58 }
 0x437   :  { %v1180_v20 = vpack.c.b16 %v1179_v17, %v1179_v17 }
 0x439   :  { %1238 = vmatmul.bf16.vlgmr.msra.gmra.mxu1 %v1180_v20 }
 0x4b6   :  { %v1239_v29 = vpop.f32.mrf.mxu1 }
 0x4b7   :  { %v1240_v0 = vadd.f32 %v1838_v57, %v1239_v29 }
 0x4b9   :  { %v1243_v54 = vmax.f32 %v1240_v0, 0.0 }
 0x4bb   :  { %v1244_v10 = vmul.f32 %v1243_v54, %v416_v30 }
 0x4bd   :  { %v1245_v56 = vpack.c.bf16 %v1244_v10, %v1244_v10 }
 0x4be   :  { %v1241_v60 = vpop.f32.mrf.mxu1 }
 0x4bf   :  { %1321 = vmatmul.bf16.vlgmr.msra.gmra.mxu2 %v1245_v56 }
 0x542   :  { %v1322_v61 = vpop.f32.mrf.mxu2 }
 0x543   :  { %v1323_v33 = vadd.f32 %v1839_v15, %v1322_v61 }
 0x545   :  { %v1326_v18 = vmax.f32 %v1323_v33, 0.0 }
 0x547   :  { %v1327_v34 = vpack.c.bf16 %v1326_v18, %v1326_v18 }
 0x549   :  { %1403 = vmatmul.bf16.vlgmr.msrb.gmra.mxu3 %v1327_v34 }
 0x54a   :  { %v1324_v35 = vpop.f32.mrf.mxu2 }
 0x5cc   :  { %v1404_v37 = vpop.f32.mrf.mxu3 }
 0x5cd   :  { %v1405_v38 = vadd.f32 %v1840_v16, %v1404_v37 }
 0x5cf   :  { %1408 = vst [vmem:[#allocation2] sm:$0xff] %v1405_v38 }
 0x5d0   :  { %1419 = dma.vmem_to_hbm [thread:$0]  %s1415_s22, 128, %s1417_s2, [#allocation3]  }
 0x5d4   :  { %v1406_v40 = vpop.f32.mrf.mxu3 }
 0x5d5   :  { %1931 = dma.done.wait [#allocation3], 128  }
 0x5d6   :  { %1932 = vsyncadd [#allocation3], 4294967168 }
 0x5d7   :  { %1424 = vsyncpa [#allocation3], 1 }

</bundles_post_ra>
